<compile_context>
chip_gen: v5e
topology: v5e:2x2
jax: 0.10.0
libtpu: 0.0.40
codegen_flags: <defaults>
</compile_context>

<pallas_src>
import functools

import jax
import jax.numpy as jnp
from jax import lax
from jax.experimental import pallas as pl
from jax.experimental.pallas import tpu as pltpu


def _round_up(x, m):
    return (x + m - 1) // m * m


def _vmem_capacity_bytes():
    try:
        return int(pltpu.get_tpu_info().vmem_capacity_bytes)
    except Exception:
        return 128 * 1024 * 1024


def _num_tensorcores():
    try:
        info = pltpu.get_tpu_info()
        for attr in ("num_tensorcores", "tensorcores_per_chip", "num_cores",
                     "core_count"):
            v = getattr(info, attr, None)
            if isinstance(v, int) and v > 0:
                return v
    except Exception:
        pass
    return 1


def _derive_time_block(T, BB, H, G, x_itemsize, max_tb, budget_bytes):
    """Largest time block (<= max_tb) whose per-grid-step VMEM footprint fits."""
    def need(tb):
        x_slab = 2 * tb * BB * H * x_itemsize      # double-buffered input stream
        out_slab = 2 * tb * BB * H * 4             # double-buffered f32 output slab
        xw = tb * BB * G * 4                       # pre-gate scratch (single copy)
        weights = 2 * H * G * x_itemsize           # W_ih^T + W_hh^T (single-buffered)
        misc = G * 4 + 4 * BB * H * 4 + (2 << 20)  # bias, h/c blocks, headroom
        return x_slab + out_slab + xw + weights + misc

    tb = max(1, min(max_tb, T))
    while tb > 1 and need(tb) > budget_bytes:
        tb //= 2
    return tb


# ---------------------------------------------------------------------------
# Fused kernel: slab pre-gate matmul + LSTM recurrence over a block of steps
# ---------------------------------------------------------------------------
def _lstm_fused_kernel(x_ref,       # (TB*BB, H)  embedded slab (param_dtype)
                       wih_ref,     # (H, 4H)     W_ih^T, gate-permuted
                       whh_ref,     # (H, 4H)     W_hh^T, gate-permuted
                       b_ref,       # (1, 4H)     b_ih + b_hh (f32)
                       out_ref,     # (TB, BB, H) output slab (f32)
                       hn_ref,      # (BB, H)     h carry / final hidden (f32)
                       cn_ref,      # (BB, H)     c carry / final cell   (f32)
                       xw_scr,      # (TB*BB, 4H) pre-gate scratch (f32)
                       *, hidden, block_t, block_b, seq_len, padded_len, unroll):
    H = hidden
    TB = block_t
    BB = block_b
    t_blk = pl.program_id(1)        # time axis MUST be the innermost grid axis

    @pl.when(t_blk == 0)
    def _init():
        hn_ref[...] = jnp.zeros_like(hn_ref)
        cn_ref[...] = jnp.zeros_like(cn_ref)

    # Pre-gates for the whole slab: ONE big MXU matmul, off the serial path.
    xw_scr[...] = (
        jnp.dot(x_ref[...], wih_ref[...], preferred_element_type=jnp.float32)
        + b_ref[...]
    )

    mm_dtype = whh_ref.dtype
    needs_mask = padded_len != seq_len           # static Python bool

    def step(j, carry):
        h, c = carry
        row = pl.multiple_of(j * BB, BB)
        # Single MXU push per step: h @ W_hh^T, added to the precomputed slab.
        gates = xw_scr[pl.ds(row, BB), :] + jnp.dot(
            h.astype(mm_dtype), whh_ref[...], preferred_element_type=jnp.float32)
        # Gate order was permuted to (i, f, o, g) in the wrapper:
        sig = jax.nn.sigmoid(gates[:, : 3 * H])
        i_g = sig[:, 0 * H:1 * H]
        f_g = sig[:, 1 * H:2 * H]
        o_g = sig[:, 2 * H:3 * H]
        g_g = jnp.tanh(gates[:, 3 * H:])
        c_new = f_g * c + i_g * g_g
        h_new = o_g * jnp.tanh(c_new)
        if needs_mask:                           # only traced when T is padded
            valid = (t_blk * TB + j) < seq_len
            c_new = jnp.where(valid, c_new, c)
            h_new = jnp.where(valid, h_new, h)
        out_ref[j] = h_new.astype(out_ref.dtype)
        return h_new, c_new

    h, c = lax.fori_loop(0, TB, step, (hn_ref[...], cn_ref[...]), unroll=unroll)
    # hn/cn output blocks are VMEM-resident across the time axis (constant
    # block index) -> they double as the recurrent carry.  Write every block.
    hn_ref[...] = h
    cn_ref[...] = c


def _call_recurrence(x2, wih_t, whh_t, bias, *, nb, ntb, TB, BB, H, G,
                     seq_len, padded_len, vmem_limit, unroll,
                     single_buffer_weights):
    weight_mode = (
        dict(pipeline_mode=pl.Buffered(1)) if single_buffer_weights else {})
    kernel = functools.partial(
        _lstm_fused_kernel, hidden=H, block_t=TB, block_b=BB,
        seq_len=seq_len, padded_len=padded_len, unroll=unroll)
    return pl.pallas_call(
        kernel,
        out_shape=(
            jax.ShapeDtypeStruct((nb, ntb * TB, BB, H), jnp.float32),  # output
            jax.ShapeDtypeStruct((nb, BB, H), jnp.float32),            # h_n
            jax.ShapeDtypeStruct((nb, BB, H), jnp.float32),            # c_n
        ),
        grid=(nb, ntb),
        in_specs=[
            # Input stream: one contiguous (TB*BB, H) slab per grid step,
            # double-buffered by BlockSpec so its DMA hides under compute.
            pl.BlockSpec((None, None, TB * BB, H), lambda b, t: (b, t, 0, 0)),
            # Constant-index weights / bias: fetched once, single-buffered.
            pl.BlockSpec((H, G), lambda b, t: (0, 0), **weight_mode),
            pl.BlockSpec((H, G), lambda b, t: (0, 0), **weight_mode),
            pl.BlockSpec((1, G), lambda b, t: (0, 0), **weight_mode),
        ],
        out_specs=[
            pl.BlockSpec((None, TB, BB, H), lambda b, t: (b, t, 0, 0)),
            pl.BlockSpec((None, BB, H), lambda b, t: (b, 0, 0)),
            pl.BlockSpec((None, BB, H), lambda b, t: (b, 0, 0)),
        ],
        scratch_shapes=[pltpu.VMEM((TB * BB, G), jnp.float32)],
        compiler_params=pltpu.CompilerParams(
            # batch axis shardable across TensorCores; time axis = recurrence.
            dimension_semantics=("parallel", "arbitrary"),
            vmem_limit_bytes=vmem_limit,
        ),
    )(x2, wih_t, whh_t, bias)


# ---------------------------------------------------------------------------
# Wrapper: PyTorch Encoder.forward
# ---------------------------------------------------------------------------
def encoder_forward(ids, emb, w_ih, w_hh, b_ih, b_hh, *,
                    block_t=64, param_dtype=jnp.bfloat16):
    """ids: (T, B) int32. Returns (output (T,B,H), (h_n (1,B,H), c_n (1,B,H)))."""
    ids = jnp.asarray(ids)
    emb = jnp.asarray(emb)
    T, B = ids.shape
    _, H = emb.shape
    G = 4 * H
    x_itemsize = jnp.dtype(param_dtype).itemsize

    # Gate-column permutation (i, f, g, o) -> (i, f, o, g).
    perm = jnp.concatenate([
        jnp.arange(0, 2 * H),        # i, f
        jnp.arange(3 * H, 4 * H),    # o
        jnp.arange(2 * H, 3 * H),    # g
    ])
    wih_t = jnp.asarray(w_ih)[perm].T.astype(param_dtype)               # (H, 4H)
    whh_t = jnp.asarray(w_hh)[perm].T.astype(param_dtype)               # (H, 4H)
    bias = (jnp.asarray(b_ih) + jnp.asarray(b_hh))[perm][None, :].astype(jnp.float32)

    # 1) Embedding gather: XLA HBM gather (the vocab table never enters VMEM);
    #    the table is cast once so the gathered stream is already param_dtype.
    # TODO(synk): fold the gather into the kernel via PrefetchScalarGridSpec +
    # pl.Element row gather to avoid materializing x in HBM.
    x = jnp.take(emb.astype(param_dtype), ids, axis=0)                  # (T, B, H)

    # 2) Block sizes.  Batch split only on multi-TensorCore chips with a batch
    #    big enough that each half is still a useful MXU M.
    cores = _num_tensorcores()
    if cores >= 2 and B >= 256:
        nb = 2
        BB = _round_up(-(-B // 2), 8)
    else:
        nb = 1
        BB = _round_up(B, 8)
    Bp = nb * BB

    cap = _vmem_capacity_bytes()
    budget = min(int(cap * 0.75), 100 * 1024 * 1024)
    TB = _derive_time_block(T, BB, H, G, x_itemsize, block_t, budget)
    if T % TB != 0:
        # Prefer a TB that divides T so the kernel traces no per-step masking.
        best = max(d for d in range(1, TB + 1) if T % d == 0)
        if best >= max(1, TB // 2):
            TB = best
    Tp = _round_up(T, TB)
    ntb = Tp // TB

    if (Tp, Bp) != (T, B):
        x = jnp.pad(x, ((0, Tp - T), (0, Bp - B), (0, 0)))

    # Lay x out as (nb, ntb, TB*BB, H): one contiguous 2-D slab per grid step
    # so the kernel's pre-gate projection is a single MXU matmul.
    x2 = (x.reshape(Tp, nb, BB, H)
            .transpose(1, 0, 2, 3)
            .reshape(nb, ntb, TB * BB, H))

    call = functools.partial(
        _call_recurrence,
        nb=nb, ntb=ntb, TB=TB, BB=BB, H=H, G=G,
        seq_len=T, padded_len=Tp, vmem_limit=int(budget),
        unroll=min(8, TB))
    try:
        out, hn, cn = call(x2, wih_t, whh_t, bias, single_buffer_weights=True)
    except Exception:
        # Fallback if this toolchain rejects Buffered(1) on constant blocks.
        out, hn, cn = call(x2, wih_t, whh_t, bias, single_buffer_weights=False)

    out = out.transpose(1, 0, 2, 3).reshape(Tp, Bp, H)[:T, :B]
    hn = hn.reshape(Bp, H)[:B]
    cn = cn.reshape(Bp, H)[:B]
    return out, (hn[None], cn[None])              # PyTorch (num_layers=1) layout


# ---------------------------------------------------------------------------
# Pure-JAX reference (PyTorch Embedding + nn.LSTM semantics, true f32 matmuls)
# ---------------------------------------------------------------------------
def _reference_forward(ids, emb, w_ih, w_hh, b_ih, b_hh):
    T, B = ids.shape
    H = emb.shape[1]
    x_seq = jnp.take(emb, ids, axis=0)            # (T, B, H)
    hi = jax.lax.Precision.HIGHEST

    def step(carry, x):
        h, c = carry
        gates = (jnp.dot(x, w_ih.T, precision=hi)
                 + jnp.dot(h, w_hh.T, precision=hi) + b_ih + b_hh)
        i = jax.nn.sigmoid(gates[:, 0 * H:1 * H])
        f = jax.nn.sigmoid(gates[:, 1 * H:2 * H])
        g = jnp.tanh(gates[:, 2 * H:3 * H])
        o = jax.nn.sigmoid(gates[:, 3 * H:4 * H])
        c = f * c + i * g
        h = o * jnp.tanh(c)
        return (h, c), h

    h0 = jnp.zeros((B, H), jnp.float32)
    c0 = jnp.zeros((B, H), jnp.float32)
    (hT, cT), outs = jax.lax.scan(step, (h0, c0), x_seq)
    return outs, (hT[None], cT[None])


if __name__ == "__main__":
    # Small deterministic setup.
    V = 20          # input_size (vocab)
    H = 32          # hidden_size
    T = 8           # sequence length
    B = 2           # batch

    key = jax.random.PRNGKey(0)
    k_ids, k_emb, k_wih, k_whh, k_bih, k_bhh = jax.random.split(key, 6)

    scale = 1.0 / jnp.sqrt(jnp.float32(H))
    ids = jax.random.randint(k_ids, (T, B), 0, V, dtype=jnp.int32)
    emb = jax.random.normal(k_emb, (V, H), jnp.float32)
    w_ih = jax.random.uniform(k_wih, (4 * H, H), jnp.float32, -scale, scale)
    w_hh = jax.random.uniform(k_whh, (4 * H, H), jnp.float32, -scale, scale)
    b_ih = jax.random.uniform(k_bih, (4 * H,), jnp.float32, -scale, scale)
    b_hh = jax.random.uniform(k_bhh, (4 * H,), jnp.float32, -scale, scale)

    ref_out, (ref_h, ref_c) = _reference_forward(ids, emb, w_ih, w_hh, b_ih, b_hh)

    # Default path: bf16 MXU operands (recommended on v5e/v6e/v7x); gate math,
    # c, h and accumulation stay f32 -> loose-but-meaningful tolerance.
    out_bf, (h_bf, c_bf) = encoder_forward(ids, emb, w_ih, w_hh, b_ih, b_hh)
    jax.block_until_ready((out_bf, h_bf, c_bf))
    assert out_bf.shape == (T, B, H)
    assert h_bf.shape == (1, B, H) and c_bf.shape == (1, B, H)
    assert jnp.allclose(out_bf, ref_out, atol=5e-2, rtol=5e-2)
    assert jnp.allclose(h_bf, ref_h, atol=5e-2, rtol=5e-2)
    assert jnp.allclose(c_bf, ref_c, atol=1e-1, rtol=1e-1)

    # f32 MXU-operand path: near-exact parity with the reference.
    out32, (h32, c32) = encoder_forward(
        ids, emb, w_ih, w_hh, b_ih, b_hh, param_dtype=jnp.float32)
    jax.block_until_ready((out32, h32, c32))
    assert out32.shape == (T, B, H)
    assert jnp.allclose(out32, ref_out, atol=1e-4, rtol=1e-4)
    assert jnp.allclose(h32, ref_h, atol=1e-4, rtol=1e-4)
    assert jnp.allclose(c32, ref_c, atol=1e-4, rtol=1e-4)

    print("KERNEL_OK")
</pallas_src>

<mosaic_0001>
module attributes {stable_mosaic.version = 11 : i64} {
  func.func @_lstm_fused_kernel(%arg0: i32, %arg1: i32, %arg2: memref<1x1x64x32xbf16, #tpu.memory_space<vmem>>, %arg3: memref<32x128xbf16, #tpu.memory_space<vmem>>, %arg4: memref<32x128xbf16, #tpu.memory_space<vmem>>, %arg5: memref<1x128xf32, #tpu.memory_space<vmem>>, %arg6: memref<1x8x8x32xf32, #tpu.memory_space<vmem>>, %arg7: memref<1x8x32xf32, #tpu.memory_space<vmem>>, %arg8: memref<1x8x32xf32, #tpu.memory_space<vmem>>, %arg9: memref<64x128xf32, #tpu.memory_space<vmem>>) attributes {dimension_semantics = [#tpu.dimension_semantics<parallel>, #tpu.dimension_semantics<arbitrary>], iteration_bounds = array<i64: 1, 1>, scalar_prefetch = 0 : i64, scratch_operands = 1 : i64, tpu.core_type = #tpu.core_type<tc>, window_params = [{transform_indices = @transform_0, window_bounds = array<i64: 1, 1, 64, 32>}, {pipeline_mode = #tpu.pipeline_mode<synchronous>, transform_indices = @transform_1, window_bounds = array<i64: 32, 128>}, {pipeline_mode = #tpu.pipeline_mode<synchronous>, transform_indices = @transform_2, window_bounds = array<i64: 32, 128>}, {pipeline_mode = #tpu.pipeline_mode<synchronous>, transform_indices = @transform_3, window_bounds = array<i64: 1, 128>}, {transform_indices = @transform_4, window_bounds = array<i64: 1, 8, 8, 32>}, {transform_indices = @transform_5, window_bounds = array<i64: 1, 8, 32>}, {transform_indices = @transform_6, window_bounds = array<i64: 1, 8, 32>}]} {
    %c0_i32 = arith.constant 0 : i32
    %0 = arith.cmpi eq, %arg1, %c0_i32 : i32
    %1 = arith.extui %0 : i1 to i32
    %c0_i32_0 = arith.constant 0 : i32
    %2 = arith.cmpi ne, %1, %c0_i32_0 : i32
    scf.if %2 {
      %cst_95 = arith.constant 0.000000e+00 : f32
      %245 = vector.broadcast %cst_95 : f32 to vector<8x32xf32>
      %c0_96 = arith.constant 0 : index
      %c0_97 = arith.constant 0 : index
      %c0_98 = arith.constant 0 : index
      %246 = vector.load %arg7[%c0_96, %c0_97, %c0_98] : memref<1x8x32xf32, #tpu.memory_space<vmem>>, vector<1x8x32xf32>
      %247 = vector.shape_cast %246 : vector<1x8x32xf32> to vector<8x32xf32>
      %248 = vector.shape_cast %245 : vector<8x32xf32> to vector<1x8x32xf32>
      tpu.vector_store %arg7[%c0_96, %c0_97, %c0_98], %248 {strides = array<i32>} : memref<1x8x32xf32, #tpu.memory_space<vmem>>, vector<1x8x32xf32>,
      %cst_99 = arith.constant 0.000000e+00 : f32
      %249 = vector.broadcast %cst_99 : f32 to vector<8x32xf32>
      %c0_100 = arith.constant 0 : index
      %c0_101 = arith.constant 0 : index
      %c0_102 = arith.constant 0 : index
      %250 = vector.load %arg8[%c0_100, %c0_101, %c0_102] : memref<1x8x32xf32, #tpu.memory_space<vmem>>, vector<1x8x32xf32>
      %251 = vector.shape_cast %250 : vector<1x8x32xf32> to vector<8x32xf32>
      %252 = vector.shape_cast %249 : vector<8x32xf32> to vector<1x8x32xf32>
      tpu.vector_store %arg8[%c0_100, %c0_101, %c0_102], %252 {strides = array<i32>} : memref<1x8x32xf32, #tpu.memory_space<vmem>>, vector<1x8x32xf32>,
    } else {
    }
    %c0 = arith.constant 0 : index
    %c0_1 = arith.constant 0 : index
    %c0_2 = arith.constant 0 : index
    %c0_3 = arith.constant 0 : index
    %3 = vector.load %arg2[%c0, %c0_1, %c0_2, %c0_3] : memref<1x1x64x32xbf16, #tpu.memory_space<vmem>>, vector<1x1x64x32xbf16>
    %4 = vector.shape_cast %3 : vector<1x1x64x32xbf16> to vector<64x32xbf16>
    %c0_4 = arith.constant 0 : index
    %c0_5 = arith.constant 0 : index
    %5 = vector.load %arg3[%c0_4, %c0_5] : memref<32x128xbf16, #tpu.memory_space<vmem>>, vector<32x128xbf16>
    %cst = arith.constant dense<0.000000e+00> : vector<64x128xf32>
    %6 = tpu.matmul %4, %5, %cst {dimension_numbers = #tpu.dot_dimension_numbers<[1], [0], [0], [1], [0, 0, 1, 1], [], []>} : vector<64x32xbf16>, vector<32x128xbf16>, vector<64x128xf32> -> vector<64x128xf32>
    %c0_6 = arith.constant 0 : index
    %c0_7 = arith.constant 0 : index
    %7 = vector.load %arg5[%c0_6, %c0_7] : memref<1x128xf32, #tpu.memory_space<vmem>>, vector<1x128xf32>
    %8 = vector.broadcast %7 : vector<1x128xf32> to vector<64x128xf32>
    %9 = arith.addf %6, %8 : vector<64x128xf32>
    %c0_8 = arith.constant 0 : index
    %c0_9 = arith.constant 0 : index
    %10 = vector.load %arg9[%c0_8, %c0_9] : memref<64x128xf32, #tpu.memory_space<vmem>>, vector<64x128xf32>
    tpu.vector_store %arg9[%c0_8, %c0_9], %9 {strides = array<i32>} : memref<64x128xf32, #tpu.memory_space<vmem>>, vector<64x128xf32>,
    %c0_10 = arith.constant 0 : index
    %c0_11 = arith.constant 0 : index
    %c0_12 = arith.constant 0 : index
    %11 = vector.load %arg7[%c0_10, %c0_11, %c0_12] : memref<1x8x32xf32, #tpu.memory_space<vmem>>, vector<1x8x32xf32>
    %12 = vector.shape_cast %11 : vector<1x8x32xf32> to vector<8x32xf32>
    %c0_13 = arith.constant 0 : index
    %c0_14 = arith.constant 0 : index
    %c0_15 = arith.constant 0 : index
    %13 = vector.load %arg8[%c0_13, %c0_14, %c0_15] : memref<1x8x32xf32, #tpu.memory_space<vmem>>, vector<1x8x32xf32>
    %14 = vector.shape_cast %13 : vector<1x8x32xf32> to vector<8x32xf32>
    %c0_i32_16 = arith.constant 0 : i32
    %c8_i32 = arith.constant 8 : i32
    %15 = arith.muli %c0_i32_16, %c8_i32 : i32
    %16 = tpu.assume_multiple %15, 8 : i32
    %17 = arith.index_cast %16 : i32 to index
    %c0_17 = arith.constant 0 : index
    %18 = vector.load %arg9[%17, %c0_17] : memref<64x128xf32, #tpu.memory_space<vmem>>, vector<8x128xf32>
    %19 = arith.truncf %12 : vector<8x32xf32> to vector<8x32xbf16>
    %c0_18 = arith.constant 0 : index
    %c0_19 = arith.constant 0 : index
    %20 = vector.load %arg4[%c0_18, %c0_19] : memref<32x128xbf16, #tpu.memory_space<vmem>>, vector<32x128xbf16>
    %cst_20 = arith.constant dense<0.000000e+00> : vector<8x128xf32>
    %21 = tpu.matmul %19, %20, %cst_20 {dimension_numbers = #tpu.dot_dimension_numbers<[1], [0], [0], [1], [0, 0, 1, 1], [], []>} : vector<8x32xbf16>, vector<32x128xbf16>, vector<8x128xf32> -> vector<8x128xf32>
    %22 = arith.addf %18, %21 : vector<8x128xf32>
    %23 = vector.extract_strided_slice %22 {offsets = [0, 0], sizes = [8, 96], strides = [1, 1]} : vector<8x128xf32> to vector<8x96xf32>
    %24 = arith.negf %23 : vector<8x96xf32>
    %25 = math.exp %24 : vector<8x96xf32>
    %cst_21 = arith.constant 1.000000e+00 : f32
    %26 = vector.broadcast %cst_21 : f32 to vector<8x96xf32>
    %27 = arith.addf %26, %25 : vector<8x96xf32>
    %28 = arith.divf %26, %27 : vector<8x96xf32>
    %29 = vector.extract_strided_slice %28 {offsets = [0, 0], sizes = [8, 32], strides = [1, 1]} : vector<8x96xf32> to vector<8x32xf32>
    %30 = vector.extract_strided_slice %28 {offsets = [0, 32], sizes = [8, 32], strides = [1, 1]} : vector<8x96xf32> to vector<8x32xf32>
    %31 = vector.extract_strided_slice %28 {offsets = [0, 64], sizes = [8, 32], strides = [1, 1]} : vector<8x96xf32> to vector<8x32xf32>
    %32 = vector.extract_strided_slice %22 {offsets = [0, 96], sizes = [8, 32], strides = [1, 1]} : vector<8x128xf32> to vector<8x32xf32>
    %33 = math.tanh %32 : vector<8x32xf32>
    %34 = arith.mulf %30, %14 : vector<8x32xf32>
    %35 = arith.mulf %29, %33 : vector<8x32xf32>
    %36 = arith.addf %34, %35 : vector<8x32xf32>
    %37 = math.tanh %36 : vector<8x32xf32>
    %38 = arith.mulf %31, %37 : vector<8x32xf32>
    %c0_22 = arith.constant 0 : index
    %39 = arith.index_cast %c0_i32_16 : i32 to index
    %c0_23 = arith.constant 0 : index
    %c0_24 = arith.constant 0 : index
    %40 = vector.load %arg6[%c0_22, %39, %c0_23, %c0_24] : memref<1x8x8x32xf32, #tpu.memory_space<vmem>>, vector<1x1x8x32xf32>
    %41 = vector.shape_cast %40 : vector<1x1x8x32xf32> to vector<8x32xf32>
    %42 = vector.shape_cast %38 : vector<8x32xf32> to vector<1x1x8x32xf32>
    tpu.vector_store %arg6[%c0_22, %39, %c0_23, %c0_24], %42 {strides = array<i32>} : memref<1x8x8x32xf32, #tpu.memory_space<vmem>>, vector<1x1x8x32xf32>,
    %c1_i32 = arith.constant 1 : i32
    %c8_i32_25 = arith.constant 8 : i32
    %43 = arith.muli %c1_i32, %c8_i32_25 : i32
    %44 = tpu.assume_multiple %43, 8 : i32
    %45 = arith.index_cast %44 : i32 to index
    %c0_26 = arith.constant 0 : index
    %46 = vector.load %arg9[%45, %c0_26] : memref<64x128xf32, #tpu.memory_space<vmem>>, vector<8x128xf32>
    %47 = arith.truncf %38 : vector<8x32xf32> to vector<8x32xbf16>
    %c0_27 = arith.constant 0 : index
    %c0_28 = arith.constant 0 : index
    %48 = vector.load %arg4[%c0_27, %c0_28] : memref<32x128xbf16, #tpu.memory_space<vmem>>, vector<32x128xbf16>
    %cst_29 = arith.constant dense<0.000000e+00> : vector<8x128xf32>
    %49 = tpu.matmul %47, %48, %cst_29 {dimension_numbers = #tpu.dot_dimension_numbers<[1], [0], [0], [1], [0, 0, 1, 1], [], []>} : vector<8x32xbf16>, vector<32x128xbf16>, vector<8x128xf32> -> vector<8x128xf32>
    %50 = arith.addf %46, %49 : vector<8x128xf32>
    %51 = vector.extract_strided_slice %50 {offsets = [0, 0], sizes = [8, 96], strides = [1, 1]} : vector<8x128xf32> to vector<8x96xf32>
    %52 = arith.negf %51 : vector<8x96xf32>
    %53 = math.exp %52 : vector<8x96xf32>
    %cst_30 = arith.constant 1.000000e+00 : f32
    %54 = vector.broadcast %cst_30 : f32 to vector<8x96xf32>
    %55 = arith.addf %54, %53 : vector<8x96xf32>
    %56 = arith.divf %54, %55 : vector<8x96xf32>
    %57 = vector.extract_strided_slice %56 {offsets = [0, 0], sizes = [8, 32], strides = [1, 1]} : vector<8x96xf32> to vector<8x32xf32>
    %58 = vector.extract_strided_slice %56 {offsets = [0, 32], sizes = [8, 32], strides = [1, 1]} : vector<8x96xf32> to vector<8x32xf32>
    %59 = vector.extract_strided_slice %56 {offsets = [0, 64], sizes = [8, 32], strides = [1, 1]} : vector<8x96xf32> to vector<8x32xf32>
    %60 = vector.extract_strided_slice %50 {offsets = [0, 96], sizes = [8, 32], strides = [1, 1]} : vector<8x128xf32> to vector<8x32xf32>
    %61 = math.tanh %60 : vector<8x32xf32>
    %62 = arith.mulf %58, %36 : vector<8x32xf32>
    %63 = arith.mulf %57, %61 : vector<8x32xf32>
    %64 = arith.addf %62, %63 : vector<8x32xf32>
    %65 = math.tanh %64 : vector<8x32xf32>
    %66 = arith.mulf %59, %65 : vector<8x32xf32>
    %c0_31 = arith.constant 0 : index
    %67 = arith.index_cast %c1_i32 : i32 to index
    %c0_32 = arith.constant 0 : index
    %c0_33 = arith.constant 0 : index
    %68 = vector.load %arg6[%c0_31, %67, %c0_32, %c0_33] : memref<1x8x8x32xf32, #tpu.memory_space<vmem>>, vector<1x1x8x32xf32>
    %69 = vector.shape_cast %68 : vector<1x1x8x32xf32> to vector<8x32xf32>
    %70 = vector.shape_cast %66 : vector<8x32xf32> to vector<1x1x8x32xf32>
    tpu.vector_store %arg6[%c0_31, %67, %c0_32, %c0_33], %70 {strides = array<i32>} : memref<1x8x8x32xf32, #tpu.memory_space<vmem>>, vector<1x1x8x32xf32>,
    %c2_i32 = arith.constant 2 : i32
    %c8_i32_34 = arith.constant 8 : i32
    %71 = arith.muli %c2_i32, %c8_i32_34 : i32
    %72 = tpu.assume_multiple %71, 8 : i32
    %73 = arith.index_cast %72 : i32 to index
    %c0_35 = arith.constant 0 : index
    %74 = vector.load %arg9[%73, %c0_35] : memref<64x128xf32, #tpu.memory_space<vmem>>, vector<8x128xf32>
    %75 = arith.truncf %66 : vector<8x32xf32> to vector<8x32xbf16>
    %c0_36 = arith.constant 0 : index
    %c0_37 = arith.constant 0 : index
    %76 = vector.load %arg4[%c0_36, %c0_37] : memref<32x128xbf16, #tpu.memory_space<vmem>>, vector<32x128xbf16>
    %cst_38 = arith.constant dense<0.000000e+00> : vector<8x128xf32>
    %77 = tpu.matmul %75, %76, %cst_38 {dimension_numbers = #tpu.dot_dimension_numbers<[1], [0], [0], [1], [0, 0, 1, 1], [], []>} : vector<8x32xbf16>, vector<32x128xbf16>, vector<8x128xf32> -> vector<8x128xf32>
    %78 = arith.addf %74, %77 : vector<8x128xf32>
    %79 = vector.extract_strided_slice %78 {offsets = [0, 0], sizes = [8, 96], strides = [1, 1]} : vector<8x128xf32> to vector<8x96xf32>
    %80 = arith.negf %79 : vector<8x96xf32>
    %81 = math.exp %80 : vector<8x96xf32>
    %cst_39 = arith.constant 1.000000e+00 : f32
    %82 = vector.broadcast %cst_39 : f32 to vector<8x96xf32>
    %83 = arith.addf %82, %81 : vector<8x96xf32>
    %84 = arith.divf %82, %83 : vector<8x96xf32>
    %85 = vector.extract_strided_slice %84 {offsets = [0, 0], sizes = [8, 32], strides = [1, 1]} : vector<8x96xf32> to vector<8x32xf32>
    %86 = vector.extract_strided_slice %84 {offsets = [0, 32], sizes = [8, 32], strides = [1, 1]} : vector<8x96xf32> to vector<8x32xf32>
    %87 = vector.extract_strided_slice %84 {offsets = [0, 64], sizes = [8, 32], strides = [1, 1]} : vector<8x96xf32> to vector<8x32xf32>
    %88 = vector.extract_strided_slice %78 {offsets = [0, 96], sizes = [8, 32], strides = [1, 1]} : vector<8x128xf32> to vector<8x32xf32>
    %89 = math.tanh %88 : vector<8x32xf32>
    %90 = arith.mulf %86, %64 : vector<8x32xf32>
    %91 = arith.mulf %85, %89 : vector<8x32xf32>
    %92 = arith.addf %90, %91 : vector<8x32xf32>
    %93 = math.tanh %92 : vector<8x32xf32>
    %94 = arith.mulf %87, %93 : vector<8x32xf32>
    %c0_40 = arith.constant 0 : index
    %95 = arith.index_cast %c2_i32 : i32 to index
    %c0_41 = arith.constant 0 : index
    %c0_42 = arith.constant 0 : index
    %96 = vector.load %arg6[%c0_40, %95, %c0_41, %c0_42] : memref<1x8x8x32xf32, #tpu.memory_space<vmem>>, vector<1x1x8x32xf32>
    %97 = vector.shape_cast %96 : vector<1x1x8x32xf32> to vector<8x32xf32>
    %98 = vector.shape_cast %94 : vector<8x32xf32> to vector<1x1x8x32xf32>
    tpu.vector_store %arg6[%c0_40, %95, %c0_41, %c0_42], %98 {strides = array<i32>} : memref<1x8x8x32xf32, #tpu.memory_space<vmem>>, vector<1x1x8x32xf32>,
    %c3_i32 = arith.constant 3 : i32
    %c8_i32_43 = arith.constant 8 : i32
    %99 = arith.muli %c3_i32, %c8_i32_43 : i32
    %100 = tpu.assume_multiple %99, 8 : i32
    %101 = arith.index_cast %100 : i32 to index
    %c0_44 = arith.constant 0 : index
    %102 = vector.load %arg9[%101, %c0_44] : memref<64x128xf32, #tpu.memory_space<vmem>>, vector<8x128xf32>
    %103 = arith.truncf %94 : vector<8x32xf32> to vector<8x32xbf16>
    %c0_45 = arith.constant 0 : index
    %c0_46 = arith.constant 0 : index
    %104 = vector.load %arg4[%c0_45, %c0_46] : memref<32x128xbf16, #tpu.memory_space<vmem>>, vector<32x128xbf16>
    %cst_47 = arith.constant dense<0.000000e+00> : vector<8x128xf32>
    %105 = tpu.matmul %103, %104, %cst_47 {dimension_numbers = #tpu.dot_dimension_numbers<[1], [0], [0], [1], [0, 0, 1, 1], [], []>} : vector<8x32xbf16>, vector<32x128xbf16>, vector<8x128xf32> -> vector<8x128xf32>
    %106 = arith.addf %102, %105 : vector<8x128xf32>
    %107 = vector.extract_strided_slice %106 {offsets = [0, 0], sizes = [8, 96], strides = [1, 1]} : vector<8x128xf32> to vector<8x96xf32>
    %108 = arith.negf %107 : vector<8x96xf32>
    %109 = math.exp %108 : vector<8x96xf32>
    %cst_48 = arith.constant 1.000000e+00 : f32
    %110 = vector.broadcast %cst_48 : f32 to vector<8x96xf32>
    %111 = arith.addf %110, %109 : vector<8x96xf32>
    %112 = arith.divf %110, %111 : vector<8x96xf32>
    %113 = vector.extract_strided_slice %112 {offsets = [0, 0], sizes = [8, 32], strides = [1, 1]} : vector<8x96xf32> to vector<8x32xf32>
    %114 = vector.extract_strided_slice %112 {offsets = [0, 32], sizes = [8, 32], strides = [1, 1]} : vector<8x96xf32> to vector<8x32xf32>
    %115 = vector.extract_strided_slice %112 {offsets = [0, 64], sizes = [8, 32], strides = [1, 1]} : vector<8x96xf32> to vector<8x32xf32>
    %116 = vector.extract_strided_slice %106 {offsets = [0, 96], sizes = [8, 32], strides = [1, 1]} : vector<8x128xf32> to vector<8x32xf32>
    %117 = math.tanh %116 : vector<8x32xf32>
    %118 = arith.mulf %114, %92 : vector<8x32xf32>
    %119 = arith.mulf %113, %117 : vector<8x32xf32>
    %120 = arith.addf %118, %119 : vector<8x32xf32>
    %121 = math.tanh %120 : vector<8x32xf32>
    %122 = arith.mulf %115, %121 : vector<8x32xf32>
    %c0_49 = arith.constant 0 : index
    %123 = arith.index_cast %c3_i32 : i32 to index
    %c0_50 = arith.constant 0 : index
    %c0_51 = arith.constant 0 : index
    %124 = vector.load %arg6[%c0_49, %123, %c0_50, %c0_51] : memref<1x8x8x32xf32, #tpu.memory_space<vmem>>, vector<1x1x8x32xf32>
    %125 = vector.shape_cast %124 : vector<1x1x8x32xf32> to vector<8x32xf32>
    %126 = vector.shape_cast %122 : vector<8x32xf32> to vector<1x1x8x32xf32>
    tpu.vector_store %arg6[%c0_49, %123, %c0_50, %c0_51], %126 {strides = array<i32>} : memref<1x8x8x32xf32, #tpu.memory_space<vmem>>, vector<1x1x8x32xf32>,
    %c4_i32 = arith.constant 4 : i32
    %c8_i32_52 = arith.constant 8 : i32
    %127 = arith.muli %c4_i32, %c8_i32_52 : i32
    %128 = tpu.assume_multiple %127, 8 : i32
    %129 = arith.index_cast %128 : i32 to index
    %c0_53 = arith.constant 0 : index
    %130 = vector.load %arg9[%129, %c0_53] : memref<64x128xf32, #tpu.memory_space<vmem>>, vector<8x128xf32>
    %131 = arith.truncf %122 : vector<8x32xf32> to vector<8x32xbf16>
    %c0_54 = arith.constant 0 : index
    %c0_55 = arith.constant 0 : index
    %132 = vector.load %arg4[%c0_54, %c0_55] : memref<32x128xbf16, #tpu.memory_space<vmem>>, vector<32x128xbf16>
    %cst_56 = arith.constant dense<0.000000e+00> : vector<8x128xf32>
    %133 = tpu.matmul %131, %132, %cst_56 {dimension_numbers = #tpu.dot_dimension_numbers<[1], [0], [0], [1], [0, 0, 1, 1], [], []>} : vector<8x32xbf16>, vector<32x128xbf16>, vector<8x128xf32> -> vector<8x128xf32>
    %134 = arith.addf %130, %133 : vector<8x128xf32>
    %135 = vector.extract_strided_slice %134 {offsets = [0, 0], sizes = [8, 96], strides = [1, 1]} : vector<8x128xf32> to vector<8x96xf32>
    %136 = arith.negf %135 : vector<8x96xf32>
    %137 = math.exp %136 : vector<8x96xf32>
    %cst_57 = arith.constant 1.000000e+00 : f32
    %138 = vector.broadcast %cst_57 : f32 to vector<8x96xf32>
    %139 = arith.addf %138, %137 : vector<8x96xf32>
    %140 = arith.divf %138, %139 : vector<8x96xf32>
    %141 = vector.extract_strided_slice %140 {offsets = [0, 0], sizes = [8, 32], strides = [1, 1]} : vector<8x96xf32> to vector<8x32xf32>
    %142 = vector.extract_strided_slice %140 {offsets = [0, 32], sizes = [8, 32], strides = [1, 1]} : vector<8x96xf32> to vector<8x32xf32>
    %143 = vector.extract_strided_slice %140 {offsets = [0, 64], sizes = [8, 32], strides = [1, 1]} : vector<8x96xf32> to vector<8x32xf32>
    %144 = vector.extract_strided_slice %134 {offsets = [0, 96], sizes = [8, 32], strides = [1, 1]} : vector<8x128xf32> to vector<8x32xf32>
    %145 = math.tanh %144 : vector<8x32xf32>
    %146 = arith.mulf %142, %120 : vector<8x32xf32>
    %147 = arith.mulf %141, %145 : vector<8x32xf32>
    %148 = arith.addf %146, %147 : vector<8x32xf32>
    %149 = math.tanh %148 : vector<8x32xf32>
    %150 = arith.mulf %143, %149 : vector<8x32xf32>
    %c0_58 = arith.constant 0 : index
    %151 = arith.index_cast %c4_i32 : i32 to index
    %c0_59 = arith.constant 0 : index
    %c0_60 = arith.constant 0 : index
    %152 = vector.load %arg6[%c0_58, %151, %c0_59, %c0_60] : memref<1x8x8x32xf32, #tpu.memory_space<vmem>>, vector<1x1x8x32xf32>
    %153 = vector.shape_cast %152 : vector<1x1x8x32xf32> to vector<8x32xf32>
    %154 = vector.shape_cast %150 : vector<8x32xf32> to vector<1x1x8x32xf32>
    tpu.vector_store %arg6[%c0_58, %151, %c0_59, %c0_60], %154 {strides = array<i32>} : memref<1x8x8x32xf32, #tpu.memory_space<vmem>>, vector<1x1x8x32xf32>,
    %c5_i32 = arith.constant 5 : i32
    %c8_i32_61 = arith.constant 8 : i32
    %155 = arith.muli %c5_i32, %c8_i32_61 : i32
    %156 = tpu.assume_multiple %155, 8 : i32
    %157 = arith.index_cast %156 : i32 to index
    %c0_62 = arith.constant 0 : index
    %158 = vector.load %arg9[%157, %c0_62] : memref<64x128xf32, #tpu.memory_space<vmem>>, vector<8x128xf32>
    %159 = arith.truncf %150 : vector<8x32xf32> to vector<8x32xbf16>
    %c0_63 = arith.constant 0 : index
    %c0_64 = arith.constant 0 : index
    %160 = vector.load %arg4[%c0_63, %c0_64] : memref<32x128xbf16, #tpu.memory_space<vmem>>, vector<32x128xbf16>
    %cst_65 = arith.constant dense<0.000000e+00> : vector<8x128xf32>
    %161 = tpu.matmul %159, %160, %cst_65 {dimension_numbers = #tpu.dot_dimension_numbers<[1], [0], [0], [1], [0, 0, 1, 1], [], []>} : vector<8x32xbf16>, vector<32x128xbf16>, vector<8x128xf32> -> vector<8x128xf32>
    %162 = arith.addf %158, %161 : vector<8x128xf32>
    %163 = vector.extract_strided_slice %162 {offsets = [0, 0], sizes = [8, 96], strides = [1, 1]} : vector<8x128xf32> to vector<8x96xf32>
    %164 = arith.negf %163 : vector<8x96xf32>
    %165 = math.exp %164 : vector<8x96xf32>
    %cst_66 = arith.constant 1.000000e+00 : f32
    %166 = vector.broadcast %cst_66 : f32 to vector<8x96xf32>
    %167 = arith.addf %166, %165 : vector<8x96xf32>
    %168 = arith.divf %166, %167 : vector<8x96xf32>
    %169 = vector.extract_strided_slice %168 {offsets = [0, 0], sizes = [8, 32], strides = [1, 1]} : vector<8x96xf32> to vector<8x32xf32>
    %170 = vector.extract_strided_slice %168 {offsets = [0, 32], sizes = [8, 32], strides = [1, 1]} : vector<8x96xf32> to vector<8x32xf32>
    %171 = vector.extract_strided_slice %168 {offsets = [0, 64], sizes = [8, 32], strides = [1, 1]} : vector<8x96xf32> to vector<8x32xf32>
    %172 = vector.extract_strided_slice %162 {offsets = [0, 96], sizes = [8, 32], strides = [1, 1]} : vector<8x128xf32> to vector<8x32xf32>
    %173 = math.tanh %172 : vector<8x32xf32>
    %174 = arith.mulf %170, %148 : vector<8x32xf32>
    %175 = arith.mulf %169, %173 : vector<8x32xf32>
    %176 = arith.addf %174, %175 : vector<8x32xf32>
    %177 = math.tanh %176 : vector<8x32xf32>
    %178 = arith.mulf %171, %177 : vector<8x32xf32>
    %c0_67 = arith.constant 0 : index
    %179 = arith.index_cast %c5_i32 : i32 to index
    %c0_68 = arith.constant 0 : index
    %c0_69 = arith.constant 0 : index
    %180 = vector.load %arg6[%c0_67, %179, %c0_68, %c0_69] : memref<1x8x8x32xf32, #tpu.memory_space<vmem>>, vector<1x1x8x32xf32>
    %181 = vector.shape_cast %180 : vector<1x1x8x32xf32> to vector<8x32xf32>
    %182 = vector.shape_cast %178 : vector<8x32xf32> to vector<1x1x8x32xf32>
    tpu.vector_store %arg6[%c0_67, %179, %c0_68, %c0_69], %182 {strides = array<i32>} : memref<1x8x8x32xf32, #tpu.memory_space<vmem>>, vector<1x1x8x32xf32>,
    %c6_i32 = arith.constant 6 : i32
    %c8_i32_70 = arith.constant 8 : i32
    %183 = arith.muli %c6_i32, %c8_i32_70 : i32
    %184 = tpu.assume_multiple %183, 8 : i32
    %185 = arith.index_cast %184 : i32 to index
    %c0_71 = arith.constant 0 : index
    %186 = vector.load %arg9[%185, %c0_71] : memref<64x128xf32, #tpu.memory_space<vmem>>, vector<8x128xf32>
    %187 = arith.truncf %178 : vector<8x32xf32> to vector<8x32xbf16>
    %c0_72 = arith.constant 0 : index
    %c0_73 = arith.constant 0 : index
    %188 = vector.load %arg4[%c0_72, %c0_73] : memref<32x128xbf16, #tpu.memory_space<vmem>>, vector<32x128xbf16>
    %cst_74 = arith.constant dense<0.000000e+00> : vector<8x128xf32>
    %189 = tpu.matmul %187, %188, %cst_74 {dimension_numbers = #tpu.dot_dimension_numbers<[1], [0], [0], [1], [0, 0, 1, 1], [], []>} : vector<8x32xbf16>, vector<32x128xbf16>, vector<8x128xf32> -> vector<8x128xf32>
    %190 = arith.addf %186, %189 : vector<8x128xf32>
    %191 = vector.extract_strided_slice %190 {offsets = [0, 0], sizes = [8, 96], strides = [1, 1]} : vector<8x128xf32> to vector<8x96xf32>
    %192 = arith.negf %191 : vector<8x96xf32>
    %193 = math.exp %192 : vector<8x96xf32>
    %cst_75 = arith.constant 1.000000e+00 : f32
    %194 = vector.broadcast %cst_75 : f32 to vector<8x96xf32>
    %195 = arith.addf %194, %193 : vector<8x96xf32>
    %196 = arith.divf %194, %195 : vector<8x96xf32>
    %197 = vector.extract_strided_slice %196 {offsets = [0, 0], sizes = [8, 32], strides = [1, 1]} : vector<8x96xf32> to vector<8x32xf32>
    %198 = vector.extract_strided_slice %196 {offsets = [0, 32], sizes = [8, 32], strides = [1, 1]} : vector<8x96xf32> to vector<8x32xf32>
    %199 = vector.extract_strided_slice %196 {offsets = [0, 64], sizes = [8, 32], strides = [1, 1]} : vector<8x96xf32> to vector<8x32xf32>
    %200 = vector.extract_strided_slice %190 {offsets = [0, 96], sizes = [8, 32], strides = [1, 1]} : vector<8x128xf32> to vector<8x32xf32>
    %201 = math.tanh %200 : vector<8x32xf32>
    %202 = arith.mulf %198, %176 : vector<8x32xf32>
    %203 = arith.mulf %197, %201 : vector<8x32xf32>
    %204 = arith.addf %202, %203 : vector<8x32xf32>
    %205 = math.tanh %204 : vector<8x32xf32>
    %206 = arith.mulf %199, %205 : vector<8x32xf32>
    %c0_76 = arith.constant 0 : index
    %207 = arith.index_cast %c6_i32 : i32 to index
    %c0_77 = arith.constant 0 : index
    %c0_78 = arith.constant 0 : index
    %208 = vector.load %arg6[%c0_76, %207, %c0_77, %c0_78] : memref<1x8x8x32xf32, #tpu.memory_space<vmem>>, vector<1x1x8x32xf32>
    %209 = vector.shape_cast %208 : vector<1x1x8x32xf32> to vector<8x32xf32>
    %210 = vector.shape_cast %206 : vector<8x32xf32> to vector<1x1x8x32xf32>
    tpu.vector_store %arg6[%c0_76, %207, %c0_77, %c0_78], %210 {strides = array<i32>} : memref<1x8x8x32xf32, #tpu.memory_space<vmem>>, vector<1x1x8x32xf32>,
    %c7_i32 = arith.constant 7 : i32
    %c8_i32_79 = arith.constant 8 : i32
    %211 = arith.muli %c7_i32, %c8_i32_79 : i32
    %212 = tpu.assume_multiple %211, 8 : i32
    %213 = arith.index_cast %212 : i32 to index
    %c0_80 = arith.constant 0 : index
    %214 = vector.load %arg9[%213, %c0_80] : memref<64x128xf32, #tpu.memory_space<vmem>>, vector<8x128xf32>
    %215 = arith.truncf %206 : vector<8x32xf32> to vector<8x32xbf16>
    %c0_81 = arith.constant 0 : index
    %c0_82 = arith.constant 0 : index
    %216 = vector.load %arg4[%c0_81, %c0_82] : memref<32x128xbf16, #tpu.memory_space<vmem>>, vector<32x128xbf16>
    %cst_83 = arith.constant dense<0.000000e+00> : vector<8x128xf32>
    %217 = tpu.matmul %215, %216, %cst_83 {dimension_numbers = #tpu.dot_dimension_numbers<[1], [0], [0], [1], [0, 0, 1, 1], [], []>} : vector<8x32xbf16>, vector<32x128xbf16>, vector<8x128xf32> -> vector<8x128xf32>
    %218 = arith.addf %214, %217 : vector<8x128xf32>
    %219 = vector.extract_strided_slice %218 {offsets = [0, 0], sizes = [8, 96], strides = [1, 1]} : vector<8x128xf32> to vector<8x96xf32>
    %220 = arith.negf %219 : vector<8x96xf32>
    %221 = math.exp %220 : vector<8x96xf32>
    %cst_84 = arith.constant 1.000000e+00 : f32
    %222 = vector.broadcast %cst_84 : f32 to vector<8x96xf32>
    %223 = arith.addf %222, %221 : vector<8x96xf32>
    %224 = arith.divf %222, %223 : vector<8x96xf32>
    %225 = vector.extract_strided_slice %224 {offsets = [0, 0], sizes = [8, 32], strides = [1, 1]} : vector<8x96xf32> to vector<8x32xf32>
    %226 = vector.extract_strided_slice %224 {offsets = [0, 32], sizes = [8, 32], strides = [1, 1]} : vector<8x96xf32> to vector<8x32xf32>
    %227 = vector.extract_strided_slice %224 {offsets = [0, 64], sizes = [8, 32], strides = [1, 1]} : vector<8x96xf32> to vector<8x32xf32>
    %228 = vector.extract_strided_slice %218 {offsets = [0, 96], sizes = [8, 32], strides = [1, 1]} : vector<8x128xf32> to vector<8x32xf32>
    %229 = math.tanh %228 : vector<8x32xf32>
    %230 = arith.mulf %226, %204 : vector<8x32xf32>
    %231 = arith.mulf %225, %229 : vector<8x32xf32>
    %232 = arith.addf %230, %231 : vector<8x32xf32>
    %233 = math.tanh %232 : vector<8x32xf32>
    %234 = arith.mulf %227, %233 : vector<8x32xf32>
    %c0_85 = arith.constant 0 : index
    %235 = arith.index_cast %c7_i32 : i32 to index
    %c0_86 = arith.constant 0 : index
    %c0_87 = arith.constant 0 : index
    %236 = vector.load %arg6[%c0_85, %235, %c0_86, %c0_87] : memref<1x8x8x32xf32, #tpu.memory_space<vmem>>, vector<1x1x8x32xf32>
    %237 = vector.shape_cast %236 : vector<1x1x8x32xf32> to vector<8x32xf32>
    %238 = vector.shape_cast %234 : vector<8x32xf32> to vector<1x1x8x32xf32>
    tpu.vector_store %arg6[%c0_85, %235, %c0_86, %c0_87], %238 {strides = array<i32>} : memref<1x8x8x32xf32, #tpu.memory_space<vmem>>, vector<1x1x8x32xf32>,
    %c8_i32_88 = arith.constant 8 : i32
    %c0_89 = arith.constant 0 : index
    %c0_90 = arith.constant 0 : index
    %c0_91 = arith.constant 0 : index
    %239 = vector.load %arg7[%c0_89, %c0_90, %c0_91] : memref<1x8x32xf32, #tpu.memory_space<vmem>>, vector<1x8x32xf32>
    %240 = vector.shape_cast %239 : vector<1x8x32xf32> to vector<8x32xf32>
    %241 = vector.shape_cast %234 : vector<8x32xf32> to vector<1x8x32xf32>
    tpu.vector_store %arg7[%c0_89, %c0_90, %c0_91], %241 {strides = array<i32>} : memref<1x8x32xf32, #tpu.memory_space<vmem>>, vector<1x8x32xf32>,
    %c0_92 = arith.constant 0 : index
    %c0_93 = arith.constant 0 : index
    %c0_94 = arith.constant 0 : index
    %242 = vector.load %arg8[%c0_92, %c0_93, %c0_94] : memref<1x8x32xf32, #tpu.memory_space<vmem>>, vector<1x8x32xf32>
    %243 = vector.shape_cast %242 : vector<1x8x32xf32> to vector<8x32xf32>
    %244 = vector.shape_cast %232 : vector<8x32xf32> to vector<1x8x32xf32>
    tpu.vector_store %arg8[%c0_92, %c0_93, %c0_94], %244 {strides = array<i32>} : memref<1x8x32xf32, #tpu.memory_space<vmem>>, vector<1x8x32xf32>,
    return
  }
  func.func @transform_0(%arg0: i32, %arg1: i32) -> (i32, i32, i32, i32) {
    %c0_i32 = arith.constant 0 : i32
    %c0_i32_0 = arith.constant 0 : i32
    %c0_i32_1 = arith.constant 0 : i32
    return %arg0, %arg1, %c0_i32, %c0_i32_0 : i32, i32, i32, i32
  }
  func.func @transform_1(%arg0: i32, %arg1: i32) -> (i32, i32) {
    %c0_i32 = arith.constant 0 : i32
    %c0_i32_0 = arith.constant 0 : i32
    %c0_i32_1 = arith.constant 0 : i32
    return %c0_i32, %c0_i32_0 : i32, i32
  }
  func.func @transform_2(%arg0: i32, %arg1: i32) -> (i32, i32) {
    %c0_i32 = arith.constant 0 : i32
    %c0_i32_0 = arith.constant 0 : i32
    %c0_i32_1 = arith.constant 0 : i32
    return %c0_i32, %c0_i32_0 : i32, i32
  }
  func.func @transform_3(%arg0: i32, %arg1: i32) -> (i32, i32) {
    %c0_i32 = arith.constant 0 : i32
    %c0_i32_0 = arith.constant 0 : i32
    %c0_i32_1 = arith.constant 0 : i32
    return %c0_i32, %c0_i32_0 : i32, i32
  }
  func.func @transform_4(%arg0: i32, %arg1: i32) -> (i32, i32, i32, i32) {
    %c0_i32 = arith.constant 0 : i32
    %c0_i32_0 = arith.constant 0 : i32
    %c0_i32_1 = arith.constant 0 : i32
    return %arg0, %arg1, %c0_i32, %c0_i32_0 : i32, i32, i32, i32
  }
  func.func @transform_5(%arg0: i32, %arg1: i32) -> (i32, i32, i32) {
    %c0_i32 = arith.constant 0 : i32
    %c0_i32_0 = arith.constant 0 : i32
    %c0_i32_1 = arith.constant 0 : i32
    return %arg0, %c0_i32, %c0_i32_0 : i32, i32, i32
  }
  func.func @transform_6(%arg0: i32, %arg1: i32) -> (i32, i32, i32) {
    %c0_i32 = arith.constant 0 : i32
    %c0_i32_0 = arith.constant 0 : i32
    %c0_i32_1 = arith.constant 0 : i32
    return %arg0, %c0_i32, %c0_i32_0 : i32, i32, i32
  }
}

module attributes {stable_mosaic.version = 11 : i64} {
  func.func @_lstm_fused_kernel(%arg0: i32, %arg1: i32, %arg2: memref<1x1x64x32xbf16, #tpu.memory_space<vmem>>, %arg3: memref<32x128xbf16, #tpu.memory_space<vmem>>, %arg4: memref<32x128xbf16, #tpu.memory_space<vmem>>, %arg5: memref<1x128xf32, #tpu.memory_space<vmem>>, %arg6: memref<1x8x8x32xf32, #tpu.memory_space<vmem>>, %arg7: memref<1x8x32xf32, #tpu.memory_space<vmem>>, %arg8: memref<1x8x32xf32, #tpu.memory_space<vmem>>, %arg9: memref<64x128xf32, #tpu.memory_space<vmem>>) attributes {dimension_semantics = [#tpu.dimension_semantics<parallel>, #tpu.dimension_semantics<arbitrary>], iteration_bounds = array<i64: 1, 1>, scalar_prefetch = 0 : i64, scratch_operands = 1 : i64, tpu.core_type = #tpu.core_type<tc>, window_params = [{transform_indices = @transform_0, window_bounds = array<i64: 1, 1, 64, 32>}, {pipeline_mode = #tpu.pipeline_mode<synchronous>, transform_indices = @transform_1, window_bounds = array<i64: 32, 128>}, {pipeline_mode = #tpu.pipeline_mode<synchronous>, transform_indices = @transform_2, window_bounds = array<i64: 32, 128>}, {pipeline_mode = #tpu.pipeline_mode<synchronous>, transform_indices = @transform_3, window_bounds = array<i64: 1, 128>}, {transform_indices = @transform_4, window_bounds = array<i64: 1, 8, 8, 32>}, {transform_indices = @transform_5, window_bounds = array<i64: 1, 8, 32>}, {transform_indices = @transform_6, window_bounds = array<i64: 1, 8, 32>}]} {
    %c0_i32 = arith.constant 0 : i32
    %0 = arith.cmpi eq, %arg1, %c0_i32 : i32
    %1 = arith.extui %0 : i1 to i32
    %c0_i32_0 = arith.constant 0 : i32
    %2 = arith.cmpi ne, %1, %c0_i32_0 : i32
    scf.if %2 {
      %cst_95 = arith.constant 0.000000e+00 : f32
      %245 = vector.broadcast %cst_95 : f32 to vector<8x32xf32>
      %c0_96 = arith.constant 0 : index
      %c0_97 = arith.constant 0 : index
      %c0_98 = arith.constant 0 : index
      %246 = vector.load %arg7[%c0_96, %c0_97, %c0_98] : memref<1x8x32xf32, #tpu.memory_space<vmem>>, vector<1x8x32xf32>
      %247 = vector.shape_cast %246 : vector<1x8x32xf32> to vector<8x32xf32>
      %248 = vector.shape_cast %245 : vector<8x32xf32> to vector<1x8x32xf32>
      tpu.vector_store %arg7[%c0_96, %c0_97, %c0_98], %248 {strides = array<i32>} : memref<1x8x32xf32, #tpu.memory_space<vmem>>, vector<1x8x32xf32>,
      %cst_99 = arith.constant 0.000000e+00 : f32
      %249 = vector.broadcast %cst_99 : f32 to vector<8x32xf32>
      %c0_100 = arith.constant 0 : index
      %c0_101 = arith.constant 0 : index
      %c0_102 = arith.constant 0 : index
      %250 = vector.load %arg8[%c0_100, %c0_101, %c0_102] : memref<1x8x32xf32, #tpu.memory_space<vmem>>, vector<1x8x32xf32>
      %251 = vector.shape_cast %250 : vector<1x8x32xf32> to vector<8x32xf32>
      %252 = vector.shape_cast %249 : vector<8x32xf32> to vector<1x8x32xf32>
      tpu.vector_store %arg8[%c0_100, %c0_101, %c0_102], %252 {strides = array<i32>} : memref<1x8x32xf32, #tpu.memory_space<vmem>>, vector<1x8x32xf32>,
    } else {
    }
    %c0 = arith.constant 0 : index
    %c0_1 = arith.constant 0 : index
    %c0_2 = arith.constant 0 : index
    %c0_3 = arith.constant 0 : index
    %3 = vector.load %arg2[%c0, %c0_1, %c0_2, %c0_3] : memref<1x1x64x32xbf16, #tpu.memory_space<vmem>>, vector<1x1x64x32xbf16>
    %4 = vector.shape_cast %3 : vector<1x1x64x32xbf16> to vector<64x32xbf16>
    %c0_4 = arith.constant 0 : index
    %c0_5 = arith.constant 0 : index
    %5 = vector.load %arg3[%c0_4, %c0_5] : memref<32x128xbf16, #tpu.memory_space<vmem>>, vector<32x128xbf16>
    %cst = arith.constant dense<0.000000e+00> : vector<64x128xf32>
    %6 = tpu.matmul %4, %5, %cst {dimension_numbers = #tpu.dot_dimension_numbers<[1], [0], [0], [1], [0, 0, 1, 1], [], []>} : vector<64x32xbf16>, vector<32x128xbf16>, vector<64x128xf32> -> vector<64x128xf32>
    %c0_6 = arith.constant 0 : index
    %c0_7 = arith.constant 0 : index
    %7 = vector.load %arg5[%c0_6, %c0_7] : memref<1x128xf32, #tpu.memory_space<vmem>>, vector<1x128xf32>
    %8 = vector.broadcast %7 : vector<1x128xf32> to vector<64x128xf32>
    %9 = arith.addf %6, %8 : vector<64x128xf32>
    %c0_8 = arith.constant 0 : index
    %c0_9 = arith.constant 0 : index
    %10 = vector.load %arg9[%c0_8, %c0_9] : memref<64x128xf32, #tpu.memory_space<vmem>>, vector<64x128xf32>
    tpu.vector_store %arg9[%c0_8, %c0_9], %9 {strides = array<i32>} : memref<64x128xf32, #tpu.memory_space<vmem>>, vector<64x128xf32>,
    %c0_10 = arith.constant 0 : index
    %c0_11 = arith.constant 0 : index
    %c0_12 = arith.constant 0 : index
    %11 = vector.load %arg7[%c0_10, %c0_11, %c0_12] : memref<1x8x32xf32, #tpu.memory_space<vmem>>, vector<1x8x32xf32>
    %12 = vector.shape_cast %11 : vector<1x8x32xf32> to vector<8x32xf32>
    %c0_13 = arith.constant 0 : index
    %c0_14 = arith.constant 0 : index
    %c0_15 = arith.constant 0 : index
    %13 = vector.load %arg8[%c0_13, %c0_14, %c0_15] : memref<1x8x32xf32, #tpu.memory_space<vmem>>, vector<1x8x32xf32>
    %14 = vector.shape_cast %13 : vector<1x8x32xf32> to vector<8x32xf32>
    %c0_i32_16 = arith.constant 0 : i32
    %c8_i32 = arith.constant 8 : i32
    %15 = arith.muli %c0_i32_16, %c8_i32 : i32
    %16 = tpu.assume_multiple %15, 8 : i32
    %17 = arith.index_cast %16 : i32 to index
    %c0_17 = arith.constant 0 : index
    %18 = vector.load %arg9[%17, %c0_17] : memref<64x128xf32, #tpu.memory_space<vmem>>, vector<8x128xf32>
    %19 = arith.truncf %12 : vector<8x32xf32> to vector<8x32xbf16>
    %c0_18 = arith.constant 0 : index
    %c0_19 = arith.constant 0 : index
    %20 = vector.load %arg4[%c0_18, %c0_19] : memref<32x128xbf16, #tpu.memory_space<vmem>>, vector<32x128xbf16>
    %cst_20 = arith.constant dense<0.000000e+00> : vector<8x128xf32>
    %21 = tpu.matmul %19, %20, %cst_20 {dimension_numbers = #tpu.dot_dimension_numbers<[1], [0], [0], [1], [0, 0, 1, 1], [], []>} : vector<8x32xbf16>, vector<32x128xbf16>, vector<8x128xf32> -> vector<8x128xf32>
    %22 = arith.addf %18, %21 : vector<8x128xf32>
    %23 = vector.extract_strided_slice %22 {offsets = [0, 0], sizes = [8, 96], strides = [1, 1]} : vector<8x128xf32> to vector<8x96xf32>
    %24 = arith.negf %23 : vector<8x96xf32>
    %25 = math.exp %24 : vector<8x96xf32>
    %cst_21 = arith.constant 1.000000e+00 : f32
    %26 = vector.broadcast %cst_21 : f32 to vector<8x96xf32>
    %27 = arith.addf %26, %25 : vector<8x96xf32>
    %28 = arith.divf %26, %27 : vector<8x96xf32>
    %29 = vector.extract_strided_slice %28 {offsets = [0, 0], sizes = [8, 32], strides = [1, 1]} : vector<8x96xf32> to vector<8x32xf32>
    %30 = vector.extract_strided_slice %28 {offsets = [0, 32], sizes = [8, 32], strides = [1, 1]} : vector<8x96xf32> to vector<8x32xf32>
    %31 = vector.extract_strided_slice %28 {offsets = [0, 64], sizes = [8, 32], strides = [1, 1]} : vector<8x96xf32> to vector<8x32xf32>
    %32 = vector.extract_strided_slice %22 {offsets = [0, 96], sizes = [8, 32], strides = [1, 1]} : vector<8x128xf32> to vector<8x32xf32>
    %33 = math.tanh %32 : vector<8x32xf32>
    %34 = arith.mulf %30, %14 : vector<8x32xf32>
    %35 = arith.mulf %29, %33 : vector<8x32xf32>
    %36 = arith.addf %34, %35 : vector<8x32xf32>
    %37 = math.tanh %36 : vector<8x32xf32>
    %38 = arith.mulf %31, %37 : vector<8x32xf32>
    %c0_22 = arith.constant 0 : index
    %39 = arith.index_cast %c0_i32_16 : i32 to index
    %c0_23 = arith.constant 0 : index
    %c0_24 = arith.constant 0 : index
    %40 = vector.load %arg6[%c0_22, %39, %c0_23, %c0_24] : memref<1x8x8x32xf32, #tpu.memory_space<vmem>>, vector<1x1x8x32xf32>
    %41 = vector.shape_cast %40 : vector<1x1x8x32xf32> to vector<8x32xf32>
    %42 = vector.shape_cast %38 : vector<8x32xf32> to vector<1x1x8x32xf32>
    tpu.vector_store %arg6[%c0_22, %39, %c0_23, %c0_24], %42 {strides = array<i32>} : memref<1x8x8x32xf32, #tpu.memory_space<vmem>>, vector<1x1x8x32xf32>,
    %c1_i32 = arith.constant 1 : i32
    %c8_i32_25 = arith.constant 8 : i32
    %43 = arith.muli %c1_i32, %c8_i32_25 : i32
    %44 = tpu.assume_multiple %43, 8 : i32
    %45 = arith.index_cast %44 : i32 to index
    %c0_26 = arith.constant 0 : index
    %46 = vector.load %arg9[%45, %c0_26] : memref<64x128xf32, #tpu.memory_space<vmem>>, vector<8x128xf32>
    %47 = arith.truncf %38 : vector<8x32xf32> to vector<8x32xbf16>
    %c0_27 = arith.constant 0 : index
    %c0_28 = arith.constant 0 : index
    %48 = vector.load %arg4[%c0_27, %c0_28] : memref<32x128xbf16, #tpu.memory_space<vmem>>, vector<32x128xbf16>
    %cst_29 = arith.constant dense<0.000000e+00> : vector<8x128xf32>
    %49 = tpu.matmul %47, %48, %cst_29 {dimension_numbers = #tpu.dot_dimension_numbers<[1], [0], [0], [1], [0, 0, 1, 1], [], []>} : vector<8x32xbf16>, vector<32x128xbf16>, vector<8x128xf32> -> vector<8x128xf32>
    %50 = arith.addf %46, %49 : vector<8x128xf32>
    %51 = vector.extract_strided_slice %50 {offsets = [0, 0], sizes = [8, 96], strides = [1, 1]} : vector<8x128xf32> to vector<8x96xf32>
    %52 = arith.negf %51 : vector<8x96xf32>
    %53 = math.exp %52 : vector<8x96xf32>
    %cst_30 = arith.constant 1.000000e+00 : f32
    %54 = vector.broadcast %cst_30 : f32 to vector<8x96xf32>
    %55 = arith.addf %54, %53 : vector<8x96xf32>
    %56 = arith.divf %54, %55 : vector<8x96xf32>
    %57 = vector.extract_strided_slice %56 {offsets = [0, 0], sizes = [8, 32], strides = [1, 1]} : vector<8x96xf32> to vector<8x32xf32>
    %58 = vector.extract_strided_slice %56 {offsets = [0, 32], sizes = [8, 32], strides = [1, 1]} : vector<8x96xf32> to vector<8x32xf32>
    %59 = vector.extract_strided_slice %56 {offsets = [0, 64], sizes = [8, 32], strides = [1, 1]} : vector<8x96xf32> to vector<8x32xf32>
    %60 = vector.extract_strided_slice %50 {offsets = [0, 96], sizes = [8, 32], strides = [1, 1]} : vector<8x128xf32> to vector<8x32xf32>
    %61 = math.tanh %60 : vector<8x32xf32>
    %62 = arith.mulf %58, %36 : vector<8x32xf32>
    %63 = arith.mulf %57, %61 : vector<8x32xf32>
    %64 = arith.addf %62, %63 : vector<8x32xf32>
    %65 = math.tanh %64 : vector<8x32xf32>
    %66 = arith.mulf %59, %65 : vector<8x32xf32>
    %c0_31 = arith.constant 0 : index
    %67 = arith.index_cast %c1_i32 : i32 to index
    %c0_32 = arith.constant 0 : index
    %c0_33 = arith.constant 0 : index
    %68 = vector.load %arg6[%c0_31, %67, %c0_32, %c0_33] : memref<1x8x8x32xf32, #tpu.memory_space<vmem>>, vector<1x1x8x32xf32>
    %69 = vector.shape_cast %68 : vector<1x1x8x32xf32> to vector<8x32xf32>
    %70 = vector.shape_cast %66 : vector<8x32xf32> to vector<1x1x8x32xf32>
    tpu.vector_store %arg6[%c0_31, %67, %c0_32, %c0_33], %70 {strides = array<i32>} : memref<1x8x8x32xf32, #tpu.memory_space<vmem>>, vector<1x1x8x32xf32>,
    %c2_i32 = arith.constant 2 : i32
    %c8_i32_34 = arith.constant 8 : i32
    %71 = arith.muli %c2_i32, %c8_i32_34 : i32
    %72 = tpu.assume_multiple %71, 8 : i32
    %73 = arith.index_cast %72 : i32 to index
    %c0_35 = arith.constant 0 : index
    %74 = vector.load %arg9[%73, %c0_35] : memref<64x128xf32, #tpu.memory_space<vmem>>, vector<8x128xf32>
    %75 = arith.truncf %66 : vector<8x32xf32> to vector<8x32xbf16>
    %c0_36 = arith.constant 0 : index
    %c0_37 = arith.constant 0 : index
    %76 = vector.load %arg4[%c0_36, %c0_37] : memref<32x128xbf16, #tpu.memory_space<vmem>>, vector<32x128xbf16>
    %cst_38 = arith.constant dense<0.000000e+00> : vector<8x128xf32>
    %77 = tpu.matmul %75, %76, %cst_38 {dimension_numbers = #tpu.dot_dimension_numbers<[1], [0], [0], [1], [0, 0, 1, 1], [], []>} : vector<8x32xbf16>, vector<32x128xbf16>, vector<8x128xf32> -> vector<8x128xf32>
    %78 = arith.addf %74, %77 : vector<8x128xf32>
    %79 = vector.extract_strided_slice %78 {offsets = [0, 0], sizes = [8, 96], strides = [1, 1]} : vector<8x128xf32> to vector<8x96xf32>
    %80 = arith.negf %79 : vector<8x96xf32>
    %81 = math.exp %80 : vector<8x96xf32>
    %cst_39 = arith.constant 1.000000e+00 : f32
    %82 = vector.broadcast %cst_39 : f32 to vector<8x96xf32>
    %83 = arith.addf %82, %81 : vector<8x96xf32>
    %84 = arith.divf %82, %83 : vector<8x96xf32>
    %85 = vector.extract_strided_slice %84 {offsets = [0, 0], sizes = [8, 32], strides = [1, 1]} : vector<8x96xf32> to vector<8x32xf32>
    %86 = vector.extract_strided_slice %84 {offsets = [0, 32], sizes = [8, 32], strides = [1, 1]} : vector<8x96xf32> to vector<8x32xf32>
    %87 = vector.extract_strided_slice %84 {offsets = [0, 64], sizes = [8, 32], strides = [1, 1]} : vector<8x96xf32> to vector<8x32xf32>
    %88 = vector.extract_strided_slice %78 {offsets = [0, 96], sizes = [8, 32], strides = [1, 1]} : vector<8x128xf32> to vector<8x32xf32>
    %89 = math.tanh %88 : vector<8x32xf32>
    %90 = arith.mulf %86, %64 : vector<8x32xf32>
    %91 = arith.mulf %85, %89 : vector<8x32xf32>
    %92 = arith.addf %90, %91 : vector<8x32xf32>
    %93 = math.tanh %92 : vector<8x32xf32>
    %94 = arith.mulf %87, %93 : vector<8x32xf32>
    %c0_40 = arith.constant 0 : index
    %95 = arith.index_cast %c2_i32 : i32 to index
    %c0_41 = arith.constant 0 : index
    %c0_42 = arith.constant 0 : index
    %96 = vector.load %arg6[%c0_40, %95, %c0_41, %c0_42] : memref<1x8x8x32xf32, #tpu.memory_space<vmem>>, vector<1x1x8x32xf32>
    %97 = vector.shape_cast %96 : vector<1x1x8x32xf32> to vector<8x32xf32>
    %98 = vector.shape_cast %94 : vector<8x32xf32> to vector<1x1x8x32xf32>
    tpu.vector_store %arg6[%c0_40, %95, %c0_41, %c0_42], %98 {strides = array<i32>} : memref<1x8x8x32xf32, #tpu.memory_space<vmem>>, vector<1x1x8x32xf32>,
    %c3_i32 = arith.constant 3 : i32
    %c8_i32_43 = arith.constant 8 : i32
    %99 = arith.muli %c3_i32, %c8_i32_43 : i32
    %100 = tpu.assume_multiple %99, 8 : i32
    %101 = arith.index_cast %100 : i32 to index
    %c0_44 = arith.constant 0 : index
    %102 = vector.load %arg9[%101, %c0_44] : memref<64x128xf32, #tpu.memory_space<vmem>>, vector<8x128xf32>
    %103 = arith.truncf %94 : vector<8x32xf32> to vector<8x32xbf16>
    %c0_45 = arith.constant 0 : index
    %c0_46 = arith.constant 0 : index
    %104 = vector.load %arg4[%c0_45, %c0_46] : memref<32x128xbf16, #tpu.memory_space<vmem>>, vector<32x128xbf16>
    %cst_47 = arith.constant dense<0.000000e+00> : vector<8x128xf32>
    %105 = tpu.matmul %103, %104, %cst_47 {dimension_numbers = #tpu.dot_dimension_numbers<[1], [0], [0], [1], [0, 0, 1, 1], [], []>} : vector<8x32xbf16>, vector<32x128xbf16>, vector<8x128xf32> -> vector<8x128xf32>
    %106 = arith.addf %102, %105 : vector<8x128xf32>
    %107 = vector.extract_strided_slice %106 {offsets = [0, 0], sizes = [8, 96], strides = [1, 1]} : vector<8x128xf32> to vector<8x96xf32>
    %108 = arith.negf %107 : vector<8x96xf32>
    %109 = math.exp %108 : vector<8x96xf32>
    %cst_48 = arith.constant 1.000000e+00 : f32
    %110 = vector.broadcast %cst_48 : f32 to vector<8x96xf32>
    %111 = arith.addf %110, %109 : vector<8x96xf32>
    %112 = arith.divf %110, %111 : vector<8x96xf32>
    %113 = vector.extract_strided_slice %112 {offsets = [0, 0], sizes = [8, 32], strides = [1, 1]} : vector<8x96xf32> to vector<8x32xf32>
    %114 = vector.extract_strided_slice %112 {offsets = [0, 32], sizes = [8, 32], strides = [1, 1]} : vector<8x96xf32> to vector<8x32xf32>
    %115 = vector.extract_strided_slice %112 {offsets = [0, 64], sizes = [8, 32], strides = [1, 1]} : vector<8x96xf32> to vector<8x32xf32>
    %116 = vector.extract_strided_slice %106 {offsets = [0, 96], sizes = [8, 32], strides = [1, 1]} : vector<8x128xf32> to vector<8x32xf32>
    %117 = math.tanh %116 : vector<8x32xf32>
    %118 = arith.mulf %114, %92 : vector<8x32xf32>
    %119 = arith.mulf %113, %117 : vector<8x32xf32>
    %120 = arith.addf %118, %119 : vector<8x32xf32>
    %121 = math.tanh %120 : vector<8x32xf32>
    %122 = arith.mulf %115, %121 : vector<8x32xf32>
    %c0_49 = arith.constant 0 : index
    %123 = arith.index_cast %c3_i32 : i32 to index
    %c0_50 = arith.constant 0 : index
    %c0_51 = arith.constant 0 : index
    %124 = vector.load %arg6[%c0_49, %123, %c0_50, %c0_51] : memref<1x8x8x32xf32, #tpu.memory_space<vmem>>, vector<1x1x8x32xf32>
    %125 = vector.shape_cast %124 : vector<1x1x8x32xf32> to vector<8x32xf32>
    %126 = vector.shape_cast %122 : vector<8x32xf32> to vector<1x1x8x32xf32>
    tpu.vector_store %arg6[%c0_49, %123, %c0_50, %c0_51], %126 {strides = array<i32>} : memref<1x8x8x32xf32, #tpu.memory_space<vmem>>, vector<1x1x8x32xf32>,
    %c4_i32 = arith.constant 4 : i32
    %c8_i32_52 = arith.constant 8 : i32
    %127 = arith.muli %c4_i32, %c8_i32_52 : i32
    %128 = tpu.assume_multiple %127, 8 : i32
    %129 = arith.index_cast %128 : i32 to index
    %c0_53 = arith.constant 0 : index
    %130 = vector.load %arg9[%129, %c0_53] : memref<64x128xf32, #tpu.memory_space<vmem>>, vector<8x128xf32>
    %131 = arith.truncf %122 : vector<8x32xf32> to vector<8x32xbf16>
    %c0_54 = arith.constant 0 : index
    %c0_55 = arith.constant 0 : index
    %132 = vector.load %arg4[%c0_54, %c0_55] : memref<32x128xbf16, #tpu.memory_space<vmem>>, vector<32x128xbf16>
    %cst_56 = arith.constant dense<0.000000e+00> : vector<8x128xf32>
    %133 = tpu.matmul %131, %132, %cst_56 {dimension_numbers = #tpu.dot_dimension_numbers<[1], [0], [0], [1], [0, 0, 1, 1], [], []>} : vector<8x32xbf16>, vector<32x128xbf16>, vector<8x128xf32> -> vector<8x128xf32>
    %134 = arith.addf %130, %133 : vector<8x128xf32>
    %135 = vector.extract_strided_slice %134 {offsets = [0, 0], sizes = [8, 96], strides = [1, 1]} : vector<8x128xf32> to vector<8x96xf32>
    %136 = arith.negf %135 : vector<8x96xf32>
    %137 = math.exp %136 : vector<8x96xf32>
    %cst_57 = arith.constant 1.000000e+00 : f32
    %138 = vector.broadcast %cst_57 : f32 to vector<8x96xf32>
    %139 = arith.addf %138, %137 : vector<8x96xf32>
    %140 = arith.divf %138, %139 : vector<8x96xf32>
    %141 = vector.extract_strided_slice %140 {offsets = [0, 0], sizes = [8, 32], strides = [1, 1]} : vector<8x96xf32> to vector<8x32xf32>
    %142 = vector.extract_strided_slice %140 {offsets = [0, 32], sizes = [8, 32], strides = [1, 1]} : vector<8x96xf32> to vector<8x32xf32>
    %143 = vector.extract_strided_slice %140 {offsets = [0, 64], sizes = [8, 32], strides = [1, 1]} : vector<8x96xf32> to vector<8x32xf32>
    %144 = vector.extract_strided_slice %134 {offsets = [0, 96], sizes = [8, 32], strides = [1, 1]} : vector<8x128xf32> to vector<8x32xf32>
    %145 = math.tanh %144 : vector<8x32xf32>
    %146 = arith.mulf %142, %120 : vector<8x32xf32>
    %147 = arith.mulf %141, %145 : vector<8x32xf32>
    %148 = arith.addf %146, %147 : vector<8x32xf32>
    %149 = math.tanh %148 : vector<8x32xf32>
    %150 = arith.mulf %143, %149 : vector<8x32xf32>
    %c0_58 = arith.constant 0 : index
    %151 = arith.index_cast %c4_i32 : i32 to index
    %c0_59 = arith.constant 0 : index
    %c0_60 = arith.constant 0 : index
    %152 = vector.load %arg6[%c0_58, %151, %c0_59, %c0_60] : memref<1x8x8x32xf32, #tpu.memory_space<vmem>>, vector<1x1x8x32xf32>
    %153 = vector.shape_cast %152 : vector<1x1x8x32xf32> to vector<8x32xf32>
    %154 = vector.shape_cast %150 : vector<8x32xf32> to vector<1x1x8x32xf32>
    tpu.vector_store %arg6[%c0_58, %151, %c0_59, %c0_60], %154 {strides = array<i32>} : memref<1x8x8x32xf32, #tpu.memory_space<vmem>>, vector<1x1x8x32xf32>,
    %c5_i32 = arith.constant 5 : i32
    %c8_i32_61 = arith.constant 8 : i32
    %155 = arith.muli %c5_i32, %c8_i32_61 : i32
    %156 = tpu.assume_multiple %155, 8 : i32
    %157 = arith.index_cast %156 : i32 to index
    %c0_62 = arith.constant 0 : index
    %158 = vector.load %arg9[%157, %c0_62] : memref<64x128xf32, #tpu.memory_space<vmem>>, vector<8x128xf32>
    %159 = arith.truncf %150 : vector<8x32xf32> to vector<8x32xbf16>
    %c0_63 = arith.constant 0 : index
    %c0_64 = arith.constant 0 : index
    %160 = vector.load %arg4[%c0_63, %c0_64] : memref<32x128xbf16, #tpu.memory_space<vmem>>, vector<32x128xbf16>
    %cst_65 = arith.constant dense<0.000000e+00> : vector<8x128xf32>
    %161 = tpu.matmul %159, %160, %cst_65 {dimension_numbers = #tpu.dot_dimension_numbers<[1], [0], [0], [1], [0, 0, 1, 1], [], []>} : vector<8x32xbf16>, vector<32x128xbf16>, vector<8x128xf32> -> vector<8x128xf32>
    %162 = arith.addf %158, %161 : vector<8x128xf32>
    %163 = vector.extract_strided_slice %162 {offsets = [0, 0], sizes = [8, 96], strides = [1, 1]} : vector<8x128xf32> to vector<8x96xf32>
    %164 = arith.negf %163 : vector<8x96xf32>
    %165 = math.exp %164 : vector<8x96xf32>
    %cst_66 = arith.constant 1.000000e+00 : f32
    %166 = vector.broadcast %cst_66 : f32 to vector<8x96xf32>
    %167 = arith.addf %166, %165 : vector<8x96xf32>
    %168 = arith.divf %166, %167 : vector<8x96xf32>
    %169 = vector.extract_strided_slice %168 {offsets = [0, 0], sizes = [8, 32], strides = [1, 1]} : vector<8x96xf32> to vector<8x32xf32>
    %170 = vector.extract_strided_slice %168 {offsets = [0, 32], sizes = [8, 32], strides = [1, 1]} : vector<8x96xf32> to vector<8x32xf32>
    %171 = vector.extract_strided_slice %168 {offsets = [0, 64], sizes = [8, 32], strides = [1, 1]} : vector<8x96xf32> to vector<8x32xf32>
    %172 = vector.extract_strided_slice %162 {offsets = [0, 96], sizes = [8, 32], strides = [1, 1]} : vector<8x128xf32> to vector<8x32xf32>
    %173 = math.tanh %172 : vector<8x32xf32>
    %174 = arith.mulf %170, %148 : vector<8x32xf32>
    %175 = arith.mulf %169, %173 : vector<8x32xf32>
    %176 = arith.addf %174, %175 : vector<8x32xf32>
    %177 = math.tanh %176 : vector<8x32xf32>
    %178 = arith.mulf %171, %177 : vector<8x32xf32>
    %c0_67 = arith.constant 0 : index
    %179 = arith.index_cast %c5_i32 : i32 to index
    %c0_68 = arith.constant 0 : index
    %c0_69 = arith.constant 0 : index
    %180 = vector.load %arg6[%c0_67, %179, %c0_68, %c0_69] : memref<1x8x8x32xf32, #tpu.memory_space<vmem>>, vector<1x1x8x32xf32>
    %181 = vector.shape_cast %180 : vector<1x1x8x32xf32> to vector<8x32xf32>
    %182 = vector.shape_cast %178 : vector<8x32xf32> to vector<1x1x8x32xf32>
    tpu.vector_store %arg6[%c0_67, %179, %c0_68, %c0_69], %182 {strides = array<i32>} : memref<1x8x8x32xf32, #tpu.memory_space<vmem>>, vector<1x1x8x32xf32>,
    %c6_i32 = arith.constant 6 : i32
    %c8_i32_70 = arith.constant 8 : i32
    %183 = arith.muli %c6_i32, %c8_i32_70 : i32
    %184 = tpu.assume_multiple %183, 8 : i32
    %185 = arith.index_cast %184 : i32 to index
    %c0_71 = arith.constant 0 : index
    %186 = vector.load %arg9[%185, %c0_71] : memref<64x128xf32, #tpu.memory_space<vmem>>, vector<8x128xf32>
    %187 = arith.truncf %178 : vector<8x32xf32> to vector<8x32xbf16>
    %c0_72 = arith.constant 0 : index
    %c0_73 = arith.constant 0 : index
    %188 = vector.load %arg4[%c0_72, %c0_73] : memref<32x128xbf16, #tpu.memory_space<vmem>>, vector<32x128xbf16>
    %cst_74 = arith.constant dense<0.000000e+00> : vector<8x128xf32>
    %189 = tpu.matmul %187, %188, %cst_74 {dimension_numbers = #tpu.dot_dimension_numbers<[1], [0], [0], [1], [0, 0, 1, 1], [], []>} : vector<8x32xbf16>, vector<32x128xbf16>, vector<8x128xf32> -> vector<8x128xf32>
    %190 = arith.addf %186, %189 : vector<8x128xf32>
    %191 = vector.extract_strided_slice %190 {offsets = [0, 0], sizes = [8, 96], strides = [1, 1]} : vector<8x128xf32> to vector<8x96xf32>
    %192 = arith.negf %191 : vector<8x96xf32>
    %193 = math.exp %192 : vector<8x96xf32>
    %cst_75 = arith.constant 1.000000e+00 : f32
    %194 = vector.broadcast %cst_75 : f32 to vector<8x96xf32>
    %195 = arith.addf %194, %193 : vector<8x96xf32>
    %196 = arith.divf %194, %195 : vector<8x96xf32>
    %197 = vector.extract_strided_slice %196 {offsets = [0, 0], sizes = [8, 32], strides = [1, 1]} : vector<8x96xf32> to vector<8x32xf32>
    %198 = vector.extract_strided_slice %196 {offsets = [0, 32], sizes = [8, 32], strides = [1, 1]} : vector<8x96xf32> to vector<8x32xf32>
    %199 = vector.extract_strided_slice %196 {offsets = [0, 64], sizes = [8, 32], strides = [1, 1]} : vector<8x96xf32> to vector<8x32xf32>
    %200 = vector.extract_strided_slice %190 {offsets = [0, 96], sizes = [8, 32], strides = [1, 1]} : vector<8x128xf32> to vector<8x32xf32>
    %201 = math.tanh %200 : vector<8x32xf32>
    %202 = arith.mulf %198, %176 : vector<8x32xf32>
    %203 = arith.mulf %197, %201 : vector<8x32xf32>
    %204 = arith.addf %202, %203 : vector<8x32xf32>
    %205 = math.tanh %204 : vector<8x32xf32>
    %206 = arith.mulf %199, %205 : vector<8x32xf32>
    %c0_76 = arith.constant 0 : index
    %207 = arith.index_cast %c6_i32 : i32 to index
    %c0_77 = arith.constant 0 : index
    %c0_78 = arith.constant 0 : index
    %208 = vector.load %arg6[%c0_76, %207, %c0_77, %c0_78] : memref<1x8x8x32xf32, #tpu.memory_space<vmem>>, vector<1x1x8x32xf32>
    %209 = vector.shape_cast %208 : vector<1x1x8x32xf32> to vector<8x32xf32>
    %210 = vector.shape_cast %206 : vector<8x32xf32> to vector<1x1x8x32xf32>
    tpu.vector_store %arg6[%c0_76, %207, %c0_77, %c0_78], %210 {strides = array<i32>} : memref<1x8x8x32xf32, #tpu.memory_space<vmem>>, vector<1x1x8x32xf32>,
    %c7_i32 = arith.constant 7 : i32
    %c8_i32_79 = arith.constant 8 : i32
    %211 = arith.muli %c7_i32, %c8_i32_79 : i32
    %212 = tpu.assume_multiple %211, 8 : i32
    %213 = arith.index_cast %212 : i32 to index
    %c0_80 = arith.constant 0 : index
    %214 = vector.load %arg9[%213, %c0_80] : memref<64x128xf32, #tpu.memory_space<vmem>>, vector<8x128xf32>
    %215 = arith.truncf %206 : vector<8x32xf32> to vector<8x32xbf16>
    %c0_81 = arith.constant 0 : index
    %c0_82 = arith.constant 0 : index
    %216 = vector.load %arg4[%c0_81, %c0_82] : memref<32x128xbf16, #tpu.memory_space<vmem>>, vector<32x128xbf16>
    %cst_83 = arith.constant dense<0.000000e+00> : vector<8x128xf32>
    %217 = tpu.matmul %215, %216, %cst_83 {dimension_numbers = #tpu.dot_dimension_numbers<[1], [0], [0], [1], [0, 0, 1, 1], [], []>} : vector<8x32xbf16>, vector<32x128xbf16>, vector<8x128xf32> -> vector<8x128xf32>
    %218 = arith.addf %214, %217 : vector<8x128xf32>
    %219 = vector.extract_strided_slice %218 {offsets = [0, 0], sizes = [8, 96], strides = [1, 1]} : vector<8x128xf32> to vector<8x96xf32>
    %220 = arith.negf %219 : vector<8x96xf32>
    %221 = math.exp %220 : vector<8x96xf32>
    %cst_84 = arith.constant 1.000000e+00 : f32
    %222 = vector.broadcast %cst_84 : f32 to vector<8x96xf32>
    %223 = arith.addf %222, %221 : vector<8x96xf32>
    %224 = arith.divf %222, %223 : vector<8x96xf32>
    %225 = vector.extract_strided_slice %224 {offsets = [0, 0], sizes = [8, 32], strides = [1, 1]} : vector<8x96xf32> to vector<8x32xf32>
    %226 = vector.extract_strided_slice %224 {offsets = [0, 32], sizes = [8, 32], strides = [1, 1]} : vector<8x96xf32> to vector<8x32xf32>
    %227 = vector.extract_strided_slice %224 {offsets = [0, 64], sizes = [8, 32], strides = [1, 1]} : vector<8x96xf32> to vector<8x32xf32>
    %228 = vector.extract_strided_slice %218 {offsets = [0, 96], sizes = [8, 32], strides = [1, 1]} : vector<8x128xf32> to vector<8x32xf32>
    %229 = math.tanh %228 : vector<8x32xf32>
    %230 = arith.mulf %226, %204 : vector<8x32xf32>
    %231 = arith.mulf %225, %229 : vector<8x32xf32>
    %232 = arith.addf %230, %231 : vector<8x32xf32>
    %233 = math.tanh %232 : vector<8x32xf32>
    %234 = arith.mulf %227, %233 : vector<8x32xf32>
    %c0_85 = arith.constant 0 : index
    %235 = arith.index_cast %c7_i32 : i32 to index
    %c0_86 = arith.constant 0 : index
    %c0_87 = arith.constant 0 : index
    %236 = vector.load %arg6[%c0_85, %235, %c0_86, %c0_87] : memref<1x8x8x32xf32, #tpu.memory_space<vmem>>, vector<1x1x8x32xf32>
    %237 = vector.shape_cast %236 : vector<1x1x8x32xf32> to vector<8x32xf32>
    %238 = vector.shape_cast %234 : vector<8x32xf32> to vector<1x1x8x32xf32>
    tpu.vector_store %arg6[%c0_85, %235, %c0_86, %c0_87], %238 {strides = array<i32>} : memref<1x8x8x32xf32, #tpu.memory_space<vmem>>, vector<1x1x8x32xf32>,
    %c8_i32_88 = arith.constant 8 : i32
    %c0_89 = arith.constant 0 : index
    %c0_90 = arith.constant 0 : index
    %c0_91 = arith.constant 0 : index
    %239 = vector.load %arg7[%c0_89, %c0_90, %c0_91] : memref<1x8x32xf32, #tpu.memory_space<vmem>>, vector<1x8x32xf32>
    %240 = vector.shape_cast %239 : vector<1x8x32xf32> to vector<8x32xf32>
    %241 = vector.shape_cast %234 : vector<8x32xf32> to vector<1x8x32xf32>
    tpu.vector_store %arg7[%c0_89, %c0_90, %c0_91], %241 {strides = array<i32>} : memref<1x8x32xf32, #tpu.memory_space<vmem>>, vector<1x8x32xf32>,
    %c0_92 = arith.constant 0 : index
    %c0_93 = arith.constant 0 : index
    %c0_94 = arith.constant 0 : index
    %242 = vector.load %arg8[%c0_92, %c0_93, %c0_94] : memref<1x8x32xf32, #tpu.memory_space<vmem>>, vector<1x8x32xf32>
    %243 = vector.shape_cast %242 : vector<1x8x32xf32> to vector<8x32xf32>
    %244 = vector.shape_cast %232 : vector<8x32xf32> to vector<1x8x32xf32>
    tpu.vector_store %arg8[%c0_92, %c0_93, %c0_94], %244 {strides = array<i32>} : memref<1x8x32xf32, #tpu.memory_space<vmem>>, vector<1x8x32xf32>,
    return
  }
  func.func @transform_0(%arg0: i32, %arg1: i32) -> (i32, i32, i32, i32) {
    %c0_i32 = arith.constant 0 : i32
    %c0_i32_0 = arith.constant 0 : i32
    %c0_i32_1 = arith.constant 0 : i32
    return %arg0, %arg1, %c0_i32, %c0_i32_0 : i32, i32, i32, i32
  }
  func.func @transform_1(%arg0: i32, %arg1: i32) -> (i32, i32) {
    %c0_i32 = arith.constant 0 : i32
    %c0_i32_0 = arith.constant 0 : i32
    %c0_i32_1 = arith.constant 0 : i32
    return %c0_i32, %c0_i32_0 : i32, i32
  }
  func.func @transform_2(%arg0: i32, %arg1: i32) -> (i32, i32) {
    %c0_i32 = arith.constant 0 : i32
    %c0_i32_0 = arith.constant 0 : i32
    %c0_i32_1 = arith.constant 0 : i32
    return %c0_i32, %c0_i32_0 : i32, i32
  }
  func.func @transform_3(%arg0: i32, %arg1: i32) -> (i32, i32) {
    %c0_i32 = arith.constant 0 : i32
    %c0_i32_0 = arith.constant 0 : i32
    %c0_i32_1 = arith.constant 0 : i32
    return %c0_i32, %c0_i32_0 : i32, i32
  }
  func.func @transform_4(%arg0: i32, %arg1: i32) -> (i32, i32, i32, i32) {
    %c0_i32 = arith.constant 0 : i32
    %c0_i32_0 = arith.constant 0 : i32
    %c0_i32_1 = arith.constant 0 : i32
    return %arg0, %arg1, %c0_i32, %c0_i32_0 : i32, i32, i32, i32
  }
  func.func @transform_5(%arg0: i32, %arg1: i32) -> (i32, i32, i32) {
    %c0_i32 = arith.constant 0 : i32
    %c0_i32_0 = arith.constant 0 : i32
    %c0_i32_1 = arith.constant 0 : i32
    return %arg0, %c0_i32, %c0_i32_0 : i32, i32, i32
  }
  func.func @transform_6(%arg0: i32, %arg1: i32) -> (i32, i32, i32) {
    %c0_i32 = arith.constant 0 : i32
    %c0_i32_0 = arith.constant 0 : i32
    %c0_i32_1 = arith.constant 0 : i32
    return %arg0, %c0_i32, %c0_i32_0 : i32, i32, i32
  }
}

</mosaic_0001>

<bundles_post_ra>
// kernel: tpu_custom_call.1
= control target key start
LH: loop header
LB: loop body
LE: loop exit
PB: predicated region body
PF: predicated region fallthrough
CT: control target
= control target key end

     0   :  { %12 = vsyncpa [#allocation4], 0  ;;  %vm27_vm0 = vcmask 261120   ;;  %v1122_v2 = vmov 0.0   ;;  %s1354_s0 = inlined_call_operand.vmem [shape: bf16[1,1,64,32], index: 0, kind: input, shape index: {}]   ;;  %s1355_s1 = inlined_call_operand.vmem [shape: bf16[32,128], index: 1, kind: input, shape index: {}]   ;;  %s1356_s2 = inlined_call_operand.vmem [shape: bf16[32,128], index: 2, kind: input, shape index: {}]   ;;  %s1357_s3 = inlined_call_operand.vmem [shape: f32[1,128], index: 3, kind: input, shape index: {}]   ;;  %s1358_s4 = inlined_call_operand.hbm [shape: f32[1,8,8,32], index: 4, kind: output, shape index: {0}]   ;;  %s1359_s5 = inlined_call_operand.hbm [shape: f32[1,8,32], index: 5, kind: output, shape index: {1}]   ;;  %s1360_s6 = inlined_call_operand.hbm [shape: f32[1,8,32], index: 6, kind: output, shape index: {2}]  }
   0x1   :  { %v953_v0 = vld [vmem:[%s1355_s1 + $0x8] sm:$0xff]  ;;  %28 = vst.msk [vmem:[#allocation5] sm:$0xff] %vm27_vm0, %v1122_v2  ;;  %v952_v3 = vld [vmem:[%s1355_s1] sm:$0xff] }
   0x2   :  { %v955_v1 = vld [vmem:[%s1356_s2 + $0x8] sm:$0xff]  ;;  %97 = vmatpush.bf16.msra.mxu0 %v953_v0  ;;  %v954_v4 = vld [vmem:[%s1356_s2] sm:$0xff]  ;;  %29 = vst.msk [vmem:[#allocation7] sm:$0xff] %vm27_vm0, %v1122_v2 }
   0x3   :  { %157 = vmatpush.bf16.msra.mxu1 %v955_v1 }
   0x4   :  { %13 = vsyncpa [#allocation6], 0  ;;  %970 = vmatpush.bf16.msra.mxu3 %v953_v0  ;;  %v948_v5 = vld [vmem:[%s1354_s0] sm:$0xff]  ;;  %s1123_s8 = smov 32   ;;  %v957_v36 = vld [vmem:[%s1356_s2 + $0x8] sm:$0xff]  ;;  %s1124_s12 = smov 64  }
   0x5   :  { %v1188_v8 = vld [vmem:[%s1357_s3] ss:$0 sm:$0xff]  ;;  %242 = vmatpush.bf16.msra.mxu2 %v957_v36  ;;  %s811_s21 = sshll.u32 %s1359_s5, 4  ;;  %s1127_s22 = smov [#allocation7]   ;;  %s812_s21 = int_to_ptr.hbm [resolvable:$true] %s811_s21 }
   0x6   :  { %98 = vmatpush.bf16.msra.mxu0 %v952_v3  ;;  %v956_v37 = vld [vmem:[%s1356_s2] sm:$0xff]  ;;  %s820_s23 = sshll.u32 %s1127_s22, 4  ;;  %s822_s26 = sshll.u32 %s1360_s6, 4  ;;  %s821_s23 = int_to_ptr.vmem [resolvable:$true] %s820_s23  ;;  %s823_s26 = int_to_ptr.hbm [resolvable:$true] %s822_s26 }
   0x7   :  { %158 = vmatpush.bf16.msra.mxu1 %v954_v4  ;;  %v959_v4 = vld [vmem:[%s1356_s2 + $0x8] sm:$0xff]  ;;  %s797_s5 = sshll.u32 %s1358_s4, 4  ;;  %s1129_s6 = smov 128   ;;  %s798_s5 = int_to_ptr.hbm [resolvable:$true] %s797_s5 }
   0x8   :  { %971 = vmatpush.bf16.msra.mxu3 %v952_v3  ;;  %v128_v6 = vld [vmem:[#allocation5] sm:$0xff]  ;;  %v951_v3 = vld [vmem:[%s1354_s0 + $0x18] sm:$0xff]  ;;  %s1130_s30 = smov 8  }
   0x9   :  { %864 = vmatmul.msk.bf16.vlgmr.msra.gmra.mxu0 %vm27_vm0, %v948_v5  ;;  %v131_v7 = vpack.c.bf16 %v128_v6, %v128_v6  ;;  %v129_v15 = vld [vmem:[#allocation7] sm:$0xff]  ;;  %243 = vmatpush.bf16.msra.mxu2 %v956_v37  ;;  %v958_v6 = vld [vmem:[%s1356_s2] sm:$0xff] }
   0xa   :  { %v949_v5 = vld [vmem:[%s1354_s0 + $0x8] sm:$0xff] }
   0xb   :  { %876 = vmatmul.msk.bf16.vlgmr.msra.gmra.mxu1 %vm27_vm0, %v131_v7  ;;  %867 = vmatmul.msk.bf16.vlgmr.msra.gmra.mxu3 %vm27_vm0, %v951_v3 }
   0xc   :  { %324 = vmatpush.bf16.msrb.mxu3 %v959_v4 }
  0x10   :  { %325 = vmatpush.bf16.msrb.mxu3 %v958_v6 }
  0x19   :  { %865 = vmatmul.msk.bf16.gmra.mxu0 %vm27_vm0, %v949_v5 }
  0x86   :  { %v100_v9 = vpop.f32.mrf.mxu0 }
  0x87   :  { %v101_v10 = vadd.f32 %v1188_v8, %v100_v9 }
  0x88   :  { %v160_v11 = vpop.f32.mrf.mxu1 }
  0x89   :  { %v164_v12 = vadd.f32 %v160_v11, %v101_v10 }
  0x8b   :  { %982 = vtanh.f32 %v164_v12  ;;  %v877_v16 = vmul.f32 -1.442695, %v164_v12 }
  0x8d   :  { %984 = vpow2.f32 %v877_v16 }
  0x8e   :  { %v102_v42 = vpop.f32.mrf.mxu0  ;;  %v1231_v12 = vpop.f32.mrf.mxu3 }
  0x8f   :  { %v103_v43 = vadd.f32 %v1188_v8, %v102_v42 }
  0x90   :  { %v162_v13 = vpop.f32.mrf.mxu1 }
  0x91   :  { %v983_v14 = vpop.eup %982 }
  0x92   :  { %191 = vrot.lane.b32.xlu0 %v983_v14, %s1123_s8 }
  0x93   :  { %v985_v17 = vpop.eup %984 }
  0x94   :  { %v168_v18 = vadd.f32 1.0, %v985_v17 }
  0x96   :  { %986 = vrcp.f32 %v168_v18  ;;  %v180_v24 = vand.u32 2147483648, %v168_v18  ;;  %vm174_vm2 = vweird.f32 %v168_v18  ;;  %v178_v25 = vand.u32 2147483647, %v168_v18  ;;  %v1233_v13 = vpop.f32.mrf.mxu3  ;;  %v105_v14 = vpop.f32.mrf.mxu0 }
  0x98   :  { %v181_v27 = vor.u32 1.1754944e-38, %v180_v24  ;;  %vm179_vm4 = vcmp.eq.f32.partialorder %v178_v25, 8.507059e+37 }
  0x9a   :  { %186 = vrot.lane.b32.xlu0 %v129_v15, %s1123_s8  ;;  %v106_v15 = vadd.f32 %v1188_v8, %v105_v14 }
  0x9c   :  { %v987_v19 = vpop.eup %986 }
  0x9d   :  { %v170_v20 = vmul.f32 %v987_v19, %v168_v18  ;;  %vm175_vm1 = vweird.f32 %v987_v19 }
  0x9e   :  { %vm176_vm3 = vmor %vm174_vm2, %vm175_vm1 }
  0x9f   :  { %v171_v21 = vsub.f32 1.0, %v170_v20 }
  0xa1   :  { %v172_v22 = vmul.f32 %v987_v19, %v171_v21 }
  0xa3   :  { %v173_v23 = vadd.f32 %v987_v19, %v172_v22 }
  0xa5   :  { %v177_v26 = vsel %vm176_vm3, %v987_v19, %v173_v23 }
  0xa6   :  { %v182_v29 = vsel %vm179_vm4, %v181_v27, %v177_v26 }
 0x104   :  { %v192_v28 = vpop.permute.xlu0 %191 }
 0x105   :  { %v194_v30 = vmul.f32 %v192_v28, %v182_v29 }
 0x107   :  { %196 = vrot.lane.b32.xlu1 %v194_v30, %s1123_s8 }
 0x10c   :  { %v187_v31 = vpop.permute.xlu0 %186 }
 0x10d   :  { %v189_v32 = vmul.f32 %v187_v31, %v182_v29 }
 0x179   :  { %v197_v33 = vpop.permute.xlu1 %196 }
 0x17a   :  { %v199_v34 = vadd.f32 %v197_v33, %v189_v32 }
 0x17c   :  { %988 = vtanh.f32 %v199_v34 }
 0x182   :  { %v989_v35 = vpop.eup %988 }
 0x183   :  { %202 = vrot.lane.b32.xlu1 %v989_v35, %s1123_s8 }
 0x1f5   :  { %v203_v38 = vpop.permute.xlu1 %202 }
 0x1f6   :  { %v1201_v39 = vmul.f32 %v203_v38, %v182_v29 }
 0x1f8   :  { %v213_v40 = vpack.c.bf16 %v1201_v39, %v1201_v39 }
 0x1fa   :  { %219 = vrot.lane.b32.xlu2 %v213_v40, %s1124_s12  ;;  %v961_v40 = vld [vmem:[%s1356_s2 + $0x8] sm:$0xff] }
 0x1fb   :  { %406 = vmatpush.bf16.msrb.mxu1 %v961_v40 }
 0x254   :  { %v220_v41 = vpop.permute.xlu2 %219 }
 0x255   :  { %886 = vmatmul.msk.bf16.vlgmr.msra.gmra.mxu2 %vm27_vm0, %v220_v41  ;;  %v960_v41 = vld [vmem:[%s1356_s2] sm:$0xff] }
 0x256   :  { %407 = vmatpush.bf16.msrb.mxu1 %v960_v41 }
 0x2d8   :  { %v245_v44 = vpop.f32.mrf.mxu2 }
 0x2d9   :  { %v249_v45 = vadd.f32 %v245_v44, %v103_v43 }
 0x2db   :  { %990 = vtanh.f32 %v249_v45  ;;  %v887_v48 = vmul.f32 -1.442695, %v249_v45 }
 0x2dd   :  { %992 = vpow2.f32 %v887_v48 }
 0x2e0   :  { %v247_v46 = vpop.f32.mrf.mxu2 }
 0x2e1   :  { %v991_v47 = vpop.eup %990  ;;  %v107_v46 = vpop.f32.mrf.mxu0 }
 0x2e2   :  { %272 = vrot.lane.b32.xlu2 %v991_v47, %s1123_s8  ;;  %v108_v47 = vadd.f32 %v1188_v8, %v107_v46  ;;  %v964_v46 = vld [vmem:[%s1356_s2] sm:$0xff] }
 0x2e3   :  { %v993_v49 = vpop.eup %992 }
 0x2e4   :  { %v253_v50 = vadd.f32 1.0, %v993_v49 }
 0x2e6   :  { %994 = vrcp.f32 %v253_v50  ;;  %v265_v56 = vand.u32 2147483648, %v253_v50  ;;  %vm259_vm6 = vweird.f32 %v253_v50  ;;  %v263_v57 = vand.u32 2147483647, %v253_v50 }
 0x2e8   :  { %v266_v59 = vor.u32 1.1754944e-38, %v265_v56  ;;  %vm264_vm8 = vcmp.eq.f32.partialorder %v263_v57, 8.507059e+37 }
 0x2ec   :  { %v995_v51 = vpop.eup %994 }
 0x2ed   :  { %v255_v52 = vmul.f32 %v995_v51, %v253_v50  ;;  %vm260_vm5 = vweird.f32 %v995_v51 }
 0x2ee   :  { %vm261_vm7 = vmor %vm259_vm6, %vm260_vm5 }
 0x2ef   :  { %v256_v53 = vsub.f32 1.0, %v255_v52 }
 0x2f1   :  { %v257_v54 = vmul.f32 %v995_v51, %v256_v53 }
 0x2f3   :  { %v258_v55 = vadd.f32 %v995_v51, %v257_v54 }
 0x2f5   :  { %v262_v58 = vsel %vm261_vm7, %v995_v51, %v258_v55 }
 0x2f6   :  { %v267_v61 = vsel %vm264_vm8, %v266_v59, %v262_v58 }
 0x2f7   :  { %v270_v63 = vmul.f32 %v267_v61, %v199_v34 }
 0x33c   :  { %v273_v60 = vpop.permute.xlu2 %272 }
 0x33d   :  { %v275_v62 = vmul.f32 %v273_v60, %v267_v61 }
 0x33f   :  { %277 = vrot.lane.b32.xlu0 %v275_v62, %s1123_s8 }
 0x3b1   :  { %v278_v0 = vpop.permute.xlu0 %277 }
 0x3b2   :  { %v280_v1 = vadd.f32 %v278_v0, %v270_v63 }
 0x3b4   :  { %996 = vtanh.f32 %v280_v1 }
 0x3ba   :  { %v997_v2 = vpop.eup %996 }
 0x3bb   :  { %283 = vrot.lane.b32.xlu1 %v997_v2, %s1123_s8 }
 0x42d   :  { %v284_v7 = vpop.permute.xlu1 %283 }
 0x42e   :  { %v1225_v9 = vmul.f32 %v284_v7, %v267_v61  ;;  %v963_v7 = vld [vmem:[%s1356_s2 + $0x8] sm:$0xff] }
 0x42f   :  { %488 = vmatpush.bf16.msrb.mxu2 %v963_v7 }
 0x430   :  { %v295_v10 = vpack.c.bf16 %v1225_v9, %v1225_v9 }
 0x432   :  { %301 = vrot.lane.b32.xlu2 %v295_v10, %s1124_s12  ;;  %v950_v10 = vld [vmem:[%s1354_s0 + $0x10] sm:$0xff] }
 0x433   :  { %866 = vmatmul.msk.bf16.gmra.mxu0 %vm27_vm0, %v950_v10 }
 0x48c   :  { %v302_v11 = vpop.permute.xlu2 %301 }
 0x48d   :  { %896 = vmatmul.msk.bf16.vlgmr.msrb.gmra.mxu3 %vm27_vm0, %v302_v11  ;;  %v962_v11 = vld [vmem:[%s1356_s2] sm:$0xff] }
 0x48e   :  { %489 = vmatpush.bf16.msrb.mxu2 %v962_v11 }
 0x510   :  { %v327_v16 = vpop.f32.mrf.mxu3 }
 0x511   :  { %v331_v17 = vadd.f32 %v327_v16, %v106_v15 }
 0x513   :  { %998 = vtanh.f32 %v331_v17  ;;  %v897_v20 = vmul.f32 -1.442695, %v331_v17 }
 0x515   :  { %1000 = vpow2.f32 %v897_v20 }
 0x518   :  { %v329_v18 = vpop.f32.mrf.mxu3 }
 0x519   :  { %v999_v19 = vpop.eup %998  ;;  %v110_v18 = vpop.f32.mrf.mxu0 }
 0x51a   :  { %354 = vrot.lane.b32.xlu0 %v999_v19, %s1123_s8  ;;  %v111_v19 = vadd.f32 %v1188_v8, %v110_v18  ;;  %v966_v18 = vld [vmem:[%s1356_s2] sm:$0xff] }
 0x51b   :  { %v1001_v21 = vpop.eup %1000 }
 0x51c   :  { %v335_v22 = vadd.f32 1.0, %v1001_v21 }
 0x51e   :  { %1002 = vrcp.f32 %v335_v22  ;;  %v347_v28 = vand.u32 2147483648, %v335_v22  ;;  %vm341_vm10 = vweird.f32 %v335_v22  ;;  %v345_v29 = vand.u32 2147483647, %v335_v22 }
 0x520   :  { %v348_v31 = vor.u32 1.1754944e-38, %v347_v28  ;;  %vm346_vm12 = vcmp.eq.f32.partialorder %v345_v29, 8.507059e+37 }
 0x524   :  { %v1003_v23 = vpop.eup %1002 }
 0x525   :  { %v337_v24 = vmul.f32 %v1003_v23, %v335_v22  ;;  %vm342_vm9 = vweird.f32 %v1003_v23 }
 0x526   :  { %vm343_vm11 = vmor %vm341_vm10, %vm342_vm9 }
 0x527   :  { %v338_v25 = vsub.f32 1.0, %v337_v24 }
 0x529   :  { %v339_v26 = vmul.f32 %v1003_v23, %v338_v25 }
 0x52b   :  { %v340_v27 = vadd.f32 %v1003_v23, %v339_v26 }
 0x52d   :  { %v344_v30 = vsel %vm343_vm11, %v1003_v23, %v340_v27 }
 0x52e   :  { %v349_v33 = vsel %vm346_vm12, %v348_v31, %v344_v30 }
 0x52f   :  { %v352_v35 = vmul.f32 %v349_v33, %v280_v1 }
 0x58c   :  { %v355_v32 = vpop.permute.xlu0 %354 }
 0x58d   :  { %v357_v34 = vmul.f32 %v355_v32, %v349_v33 }
 0x58f   :  { %359 = vrot.lane.b32.xlu1 %v357_v34, %s1123_s8 }
 0x601   :  { %v360_v36 = vpop.permute.xlu1 %359 }
 0x602   :  { %v362_v37 = vadd.f32 %v360_v36, %v352_v35 }
 0x604   :  { %1004 = vtanh.f32 %v362_v37 }
 0x60a   :  { %v1005_v38 = vpop.eup %1004 }
 0x60b   :  { %365 = vrot.lane.b32.xlu2 %v1005_v38, %s1123_s8 }
 0x665   :  { %v366_v42 = vpop.permute.xlu2 %365 }
 0x666   :  { %v1245_v43 = vmul.f32 %v366_v42, %v349_v33 }
 0x668   :  { %v377_v44 = vpack.c.bf16 %v1245_v43, %v1245_v43 }
 0x66a   :  { %383 = vrot.lane.b32.xlu0 %v377_v44, %s1124_s12 }
 0x6dc   :  { %v384_v45 = vpop.permute.xlu0 %383 }
 0x6dd   :  { %906 = vmatmul.msk.bf16.vlgmr.msrb.gmra.mxu1 %vm27_vm0, %v384_v45  ;;  %v965_v45 = vld [vmem:[%s1356_s2 + $0x8] sm:$0xff] }
 0x6de   :  { %570 = vmatpush.bf16.msra.mxu3 %v965_v45 }
 0x6e2   :  { %571 = vmatpush.bf16.msra.mxu3 %v964_v46 }
 0x75a   :  { %v409_v48 = vpop.f32.mrf.mxu1 }
 0x75b   :  { %v413_v49 = vadd.f32 %v409_v48, %v108_v47 }
 0x75d   :  { %1006 = vtanh.f32 %v413_v49  ;;  %v907_v52 = vmul.f32 -1.442695, %v413_v49 }
 0x75f   :  { %1008 = vpow2.f32 %v907_v52 }
 0x762   :  { %v411_v50 = vpop.f32.mrf.mxu1 }
 0x763   :  { %v1007_v51 = vpop.eup %1006 }
 0x764   :  { %436 = vrot.lane.b32.xlu1 %v1007_v51, %s1123_s8  ;;  %v112_v51 = vpop.f32.mrf.mxu0 }
 0x765   :  { %v1009_v53 = vpop.eup %1008  ;;  %v113_v52 = vadd.f32 %v1188_v8, %v112_v51 }
 0x766   :  { %v417_v54 = vadd.f32 1.0, %v1009_v53 }
 0x768   :  { %1010 = vrcp.f32 %v417_v54  ;;  %v429_v60 = vand.u32 2147483648, %v417_v54  ;;  %vm423_vm14 = vweird.f32 %v417_v54  ;;  %v427_v61 = vand.u32 2147483647, %v417_v54 }
 0x76a   :  { %v430_v63 = vor.u32 1.1754944e-38, %v429_v60  ;;  %vm428_vm1 = vcmp.eq.f32.partialorder %v427_v61, 8.507059e+37 }
 0x76e   :  { %v1011_v55 = vpop.eup %1010 }
 0x76f   :  { %v419_v56 = vmul.f32 %v1011_v55, %v417_v54  ;;  %vm424_vm13 = vweird.f32 %v1011_v55 }
 0x770   :  { %vm425_vm15 = vmor %vm423_vm14, %vm424_vm13 }
 0x771   :  { %v420_v57 = vsub.f32 1.0, %v419_v56 }
 0x773   :  { %v421_v58 = vmul.f32 %v1011_v55, %v420_v57 }
 0x775   :  { %v422_v59 = vadd.f32 %v1011_v55, %v421_v58 }
 0x777   :  { %v426_v62 = vsel %vm425_vm15, %v1011_v55, %v422_v59 }
 0x778   :  { %v431_v1 = vsel %vm428_vm1, %v430_v63, %v426_v62 }
 0x779   :  { %v434_v3 = vmul.f32 %v431_v1, %v362_v37 }
 0x7d6   :  { %v437_v0 = vpop.permute.xlu1 %436 }
 0x7d7   :  { %v439_v2 = vmul.f32 %v437_v0, %v431_v1 }
 0x7d9   :  { %441 = vrot.lane.b32.xlu2 %v439_v2, %s1123_s8 }
 0x833   :  { %v442_v4 = vpop.permute.xlu2 %441 }
 0x834   :  { %v444_v5 = vadd.f32 %v442_v4, %v434_v3 }
 0x836   :  { %1012 = vtanh.f32 %v444_v5 }
 0x83c   :  { %v1013_v6 = vpop.eup %1012 }
 0x83d   :  { %447 = vrot.lane.b32.xlu0 %v1013_v6, %s1123_s8 }
 0x8af   :  { %v448_v14 = vpop.permute.xlu0 %447 }
 0x8b0   :  { %v1265_v15 = vmul.f32 %v448_v14, %v431_v1 }
 0x8b2   :  { %v459_v16 = vpack.c.bf16 %v1265_v15, %v1265_v15 }
 0x8b4   :  { %465 = vrot.lane.b32.xlu1 %v459_v16, %s1124_s12 }
 0x926   :  { %v466_v17 = vpop.permute.xlu1 %465 }
 0x927   :  { %916 = vmatmul.msk.bf16.vlgmr.msrb.gmra.mxu2 %vm27_vm0, %v466_v17  ;;  %v967_v17 = vld [vmem:[%s1356_s2 + $0x8] sm:$0xff] }
 0x928   :  { %652 = vmatpush.bf16.msra.mxu1 %v967_v17 }
 0x92c   :  { %653 = vmatpush.bf16.msra.mxu1 %v966_v18 }
 0x9aa   :  { %v491_v20 = vpop.f32.mrf.mxu2 }
 0x9ab   :  { %v495_v21 = vadd.f32 %v491_v20, %v111_v19 }
 0x9ad   :  { %1014 = vtanh.f32 %v495_v21  ;;  %v917_v24 = vmul.f32 -1.442695, %v495_v21 }
 0x9af   :  { %1016 = vpow2.f32 %v917_v24 }
 0x9b2   :  { %v493_v22 = vpop.f32.mrf.mxu2 }
 0x9b3   :  { %v1015_v23 = vpop.eup %1014 }
 0x9b4   :  { %518 = vrot.lane.b32.xlu2 %v1015_v23, %s1123_s8  ;;  %v116_v23 = vadd.f32 %v1188_v8, %v1231_v12 }
 0x9b5   :  { %v1017_v25 = vpop.eup %1016 }
 0x9b6   :  { %v499_v26 = vadd.f32 1.0, %v1017_v25 }
 0x9b8   :  { %1018 = vrcp.f32 %v499_v26  ;;  %v511_v32 = vand.u32 2147483648, %v499_v26  ;;  %vm505_vm3 = vweird.f32 %v499_v26  ;;  %v509_v33 = vand.u32 2147483647, %v499_v26 }
 0x9ba   :  { %v512_v35 = vor.u32 1.1754944e-38, %v511_v32  ;;  %vm510_vm5 = vcmp.eq.f32.partialorder %v509_v33, 8.507059e+37 }
 0x9be   :  { %v1019_v27 = vpop.eup %1018 }
 0x9bf   :  { %v501_v28 = vmul.f32 %v1019_v27, %v499_v26  ;;  %vm506_vm2 = vweird.f32 %v1019_v27 }
 0x9c0   :  { %vm507_vm4 = vmor %vm505_vm3, %vm506_vm2 }
 0x9c1   :  { %v502_v29 = vsub.f32 1.0, %v501_v28 }
 0x9c3   :  { %v503_v30 = vmul.f32 %v1019_v27, %v502_v29 }
 0x9c5   :  { %v504_v31 = vadd.f32 %v1019_v27, %v503_v30 }
 0x9c7   :  { %v508_v34 = vsel %vm507_vm4, %v1019_v27, %v504_v31 }
 0x9c8   :  { %v513_v37 = vsel %vm510_vm5, %v512_v35, %v508_v34 }
 0x9c9   :  { %v516_v40 = vmul.f32 %v513_v37, %v444_v5 }
 0xa0e   :  { %v519_v36 = vpop.permute.xlu2 %518 }
 0xa0f   :  { %v521_v38 = vmul.f32 %v519_v36, %v513_v37 }
 0xa11   :  { %523 = vrot.lane.b32.xlu0 %v521_v38, %s1123_s8 }
 0xa83   :  { %v524_v41 = vpop.permute.xlu0 %523 }
 0xa84   :  { %v526_v42 = vadd.f32 %v524_v41, %v516_v40 }
 0xa86   :  { %1020 = vtanh.f32 %v526_v42 }
 0xa8c   :  { %v1021_v44 = vpop.eup %1020 }
 0xa8d   :  { %529 = vrot.lane.b32.xlu1 %v1021_v44, %s1123_s8 }
 0xaff   :  { %v530_v47 = vpop.permute.xlu1 %529 }
 0xb00   :  { %v1281_v48 = vmul.f32 %v530_v47, %v513_v37 }
 0xb02   :  { %v541_v49 = vpack.c.bf16 %v1281_v48, %v1281_v48 }
 0xb04   :  { %547 = vrot.lane.b32.xlu2 %v541_v49, %s1124_s12  ;;  %v969_v49 = vld [vmem:[%s1356_s2 + $0x8] sm:$0xff] }
 0xb05   :  { %734 = vmatpush.bf16.msra.mxu2 %v969_v49 }
 0xb5e   :  { %v548_v50 = vpop.permute.xlu2 %547 }
 0xb5f   :  { %926 = vmatmul.msk.bf16.vlgmr.msra.gmra.mxu3 %vm27_vm0, %v548_v50  ;;  %v968_v50 = vld [vmem:[%s1356_s2] sm:$0xff]  ;;  %s1125_s2 = smov 96  }
 0xb60   :  { %735 = vmatpush.bf16.msra.mxu2 %v968_v50 }
 0xbe2   :  { %v573_v53 = vpop.f32.mrf.mxu3 }
 0xbe3   :  { %v577_v54 = vadd.f32 %v573_v53, %v113_v52 }
 0xbe5   :  { %1022 = vtanh.f32 %v577_v54  ;;  %v927_v57 = vmul.f32 -1.442695, %v577_v54 }
 0xbe7   :  { %1024 = vpow2.f32 %v927_v57 }
 0xbea   :  { %v575_v55 = vpop.f32.mrf.mxu3 }
 0xbeb   :  { %v1023_v56 = vpop.eup %1022  ;;  %v118_v55 = vadd.f32 %v1188_v8, %v1233_v13 }
 0xbec   :  { %600 = vrot.lane.b32.xlu0 %v1023_v56, %s1123_s8 }
 0xbed   :  { %v1025_v58 = vpop.eup %1024 }
 0xbee   :  { %v581_v59 = vadd.f32 1.0, %v1025_v58 }
 0xbf0   :  { %1026 = vrcp.f32 %v581_v59  ;;  %v593_v1 = vand.u32 2147483648, %v581_v59  ;;  %vm587_vm7 = vweird.f32 %v581_v59  ;;  %v591_v2 = vand.u32 2147483647, %v581_v59 }
 0xbf2   :  { %v594_v4 = vor.u32 1.1754944e-38, %v593_v1  ;;  %vm592_vm9 = vcmp.eq.f32.partialorder %v591_v2, 8.507059e+37 }
 0xbf6   :  { %v1027_v60 = vpop.eup %1026 }
 0xbf7   :  { %v583_v61 = vmul.f32 %v1027_v60, %v581_v59  ;;  %vm588_vm6 = vweird.f32 %v1027_v60 }
 0xbf8   :  { %vm589_vm8 = vmor %vm587_vm7, %vm588_vm6 }
 0xbf9   :  { %v584_v62 = vsub.f32 1.0, %v583_v61 }
 0xbfb   :  { %v585_v63 = vmul.f32 %v1027_v60, %v584_v62 }
 0xbfd   :  { %v586_v0 = vadd.f32 %v1027_v60, %v585_v63 }
 0xbff   :  { %v590_v3 = vsel %vm589_vm8, %v1027_v60, %v586_v0 }
 0xc00   :  { %v595_v6 = vsel %vm592_vm9, %v594_v4, %v590_v3 }
 0xc01   :  { %v598_v10 = vmul.f32 %v595_v6, %v526_v42 }
 0xc5e   :  { %v601_v5 = vpop.permute.xlu0 %600 }
 0xc5f   :  { %v603_v7 = vmul.f32 %v601_v5, %v595_v6 }
 0xc61   :  { %605 = vrot.lane.b32.xlu1 %v603_v7, %s1123_s8 }
 0xcd3   :  { %v606_v11 = vpop.permute.xlu1 %605 }
 0xcd4   :  { %v608_v14 = vadd.f32 %v606_v11, %v598_v10 }
 0xcd6   :  { %1028 = vtanh.f32 %v608_v14 }
 0xcdc   :  { %v1029_v16 = vpop.eup %1028 }
 0xcdd   :  { %611 = vrot.lane.b32.xlu2 %v1029_v16, %s1123_s8 }
 0xd37   :  { %v612_v19 = vpop.permute.xlu2 %611 }
 0xd38   :  { %v1297_v20 = vmul.f32 %v612_v19, %v595_v6 }
 0xd3a   :  { %v623_v21 = vpack.c.bf16 %v1297_v20, %v1297_v20 }
 0xd3c   :  { %629 = vrot.lane.b32.xlu0 %v623_v21, %s1124_s12 }
 0xdae   :  { %v630_v22 = vpop.permute.xlu0 %629 }
 0xdaf   :  { %936 = vmatmul.msk.bf16.vlgmr.msra.gmra.mxu1 %vm27_vm0, %v630_v22 }
 0xe2c   :  { %v655_v24 = vpop.f32.mrf.mxu1 }
 0xe2d   :  { %v659_v25 = vadd.f32 %v655_v24, %v116_v23 }
 0xe2f   :  { %1030 = vtanh.f32 %v659_v25  ;;  %v937_v28 = vmul.f32 -1.442695, %v659_v25 }
 0xe31   :  { %1032 = vpow2.f32 %v937_v28 }
 0xe34   :  { %v657_v26 = vpop.f32.mrf.mxu1 }
 0xe35   :  { %v1031_v27 = vpop.eup %1030 }
 0xe36   :  { %682 = vrot.lane.b32.xlu1 %v1031_v27, %s1123_s8 }
 0xe37   :  { %v1033_v29 = vpop.eup %1032 }
 0xe38   :  { %v663_v30 = vadd.f32 1.0, %v1033_v29 }
 0xe3a   :  { %1034 = vrcp.f32 %v663_v30  ;;  %v675_v36 = vand.u32 2147483648, %v663_v30  ;;  %vm669_vm11 = vweird.f32 %v663_v30  ;;  %v673_v12 = vand.u32 2147483647, %v663_v30 }
 0xe3c   :  { %v676_v38 = vor.u32 1.1754944e-38, %v675_v36  ;;  %vm674_vm13 = vcmp.eq.f32.partialorder %v673_v12, 8.507059e+37 }
 0xe40   :  { %v1035_v31 = vpop.eup %1034 }
 0xe41   :  { %v665_v32 = vmul.f32 %v1035_v31, %v663_v30  ;;  %vm670_vm10 = vweird.f32 %v1035_v31 }
 0xe42   :  { %vm671_vm12 = vmor %vm669_vm11, %vm670_vm10 }
 0xe43   :  { %v666_v33 = vsub.f32 1.0, %v665_v32 }
 0xe45   :  { %v667_v34 = vmul.f32 %v1035_v31, %v666_v33 }
 0xe47   :  { %v668_v35 = vadd.f32 %v1035_v31, %v667_v34 }
 0xe49   :  { %v672_v37 = vsel %vm671_vm12, %v1035_v31, %v668_v35 }
 0xe4a   :  { %v677_v41 = vsel %vm674_vm13, %v676_v38, %v672_v37 }
 0xe4b   :  { %v680_v44 = vmul.f32 %v677_v41, %v608_v14 }
 0xea8   :  { %v683_v40 = vpop.permute.xlu1 %682 }
 0xea9   :  { %v685_v42 = vmul.f32 %v683_v40, %v677_v41 }
 0xeab   :  { %687 = vrot.lane.b32.xlu2 %v685_v42, %s1123_s8 }
 0xf05   :  { %v688_v45 = vpop.permute.xlu2 %687 }
 0xf06   :  { %v690_v46 = vadd.f32 %v688_v45, %v680_v44 }
 0xf08   :  { %1036 = vtanh.f32 %v690_v46 }
 0xf0e   :  { %v1037_v47 = vpop.eup %1036 }
 0xf0f   :  { %693 = vrot.lane.b32.xlu0 %v1037_v47, %s1123_s8 }
 0xf81   :  { %v694_v51 = vpop.permute.xlu0 %693 }
 0xf82   :  { %v696_v52 = vmul.f32 %v694_v51, %v677_v41 }
 0xf84   :  { %v705_v53 = vpack.c.bf16 %v696_v52, %v696_v52 }
 0xf86   :  { %711 = vrot.lane.b32.xlu1 %v705_v53, %s1124_s12 }
 0xff8   :  { %v712_v54 = vpop.permute.xlu1 %711 }
 0xff9   :  { %946 = vmatmul.msk.bf16.vlgmr.msra.gmra.mxu2 %vm27_vm0, %v712_v54 }
0x107c   :  { %v737_v56 = vpop.f32.mrf.mxu2 }
0x107d   :  { %v741_v57 = vadd.f32 %v737_v56, %v118_v55 }
0x107f   :  { %1038 = vtanh.f32 %v741_v57  ;;  %v947_v60 = vmul.f32 -1.442695, %v741_v57 }
0x1081   :  { %1040 = vpow2.f32 %v947_v60 }
0x1084   :  { %v739_v58 = vpop.f32.mrf.mxu2 }
0x1085   :  { %v1039_v59 = vpop.eup %1038 }
0x1086   :  { %764 = vrot.lane.b32.xlu2 %v1039_v59, %s1123_s8 }
0x1087   :  { %v1041_v61 = vpop.eup %1040 }
0x1088   :  { %v745_v62 = vadd.f32 1.0, %v1041_v61 }
0x108a   :  { %1042 = vrcp.f32 %v745_v62  ;;  %v757_v13 = vand.u32 2147483648, %v745_v62  ;;  %vm751_vm15 = vweird.f32 %v745_v62  ;;  %v755_v3 = vand.u32 2147483647, %v745_v62 }
0x108c   :  { %v758_v5 = vor.u32 1.1754944e-38, %v757_v13  ;;  %vm756_vm2 = vcmp.eq.f32.partialorder %v755_v3, 8.507059e+37 }
0x108e   :  { %370 = vrot.lane.b32.xlu2 %v1245_v43, %s1124_s12 }
0x1090   :  { %v1043_v63 = vpop.eup %1042 }
0x1091   :  { %v747_v0 = vmul.f32 %v1043_v63, %v745_v62  ;;  %vm752_vm14 = vweird.f32 %v1043_v63 }
0x1092   :  { %vm753_vm1 = vmor %vm751_vm15, %vm752_vm14 }
0x1093   :  { %v748_v1 = vsub.f32 1.0, %v747_v0 }
0x1095   :  { %v749_v2 = vmul.f32 %v1043_v63, %v748_v1 }
0x1097   :  { %v750_v8 = vadd.f32 %v1043_v63, %v749_v2 }
0x1099   :  { %v754_v4 = vsel %vm753_vm1, %v1043_v63, %v750_v8 }
0x109a   :  { %v759_v43 = vsel %vm756_vm2, %v758_v5, %v754_v4 }
0x109b   :  { %v762_v11 = vmul.f32 %v759_v43, %v690_v46 }
0x10e0   :  { %v765_v6 = vpop.permute.xlu2 %764 }
0x10e1   :  { %v767_v7 = vmul.f32 %v765_v6, %v759_v43 }
0x10e3   :  { %769 = vrot.lane.b32.xlu0 %v767_v7, %s1123_s8 }
0x10e8   :  { %v371_v10 = vpop.permute.xlu2 %370 }
0x10e9   :  { %374 = vst.msk [vmem:[#allocation3 + $0x10] sm:$0xff] %vm27_vm0, %v371_v10 }
0x10eb   :  { %207 = vrot.lane.b32.xlu0 %v1201_v39, %s1124_s12 }
0x10f3   :  { %452 = vrot.lane.b32.xlu0 %v1265_v15, %s1124_s12 }
0x10fb   :  { %698 = vrot.lane.b32.xlu0 %v696_v52, %s1124_s12 }
0x1155   :  { %v770_v14 = vpop.permute.xlu0 %769 }
0x1156   :  { %v772_v16 = vadd.f32 %v770_v14, %v762_v11 }
0x1158   :  { %1044 = vtanh.f32 %v772_v16 }
0x115d   :  { %v208_v17 = vpop.permute.xlu0 %207 }
0x115e   :  { %v1045_v18 = vpop.eup %1044  ;;  %210 = vst.msk [vmem:[#allocation3] sm:$0xff] %vm27_vm0, %v208_v17 }
0x115f   :  { %775 = vrot.lane.b32.xlu1 %v1045_v18, %s1123_s8  ;;  %s1126_s8 = smov [#allocation5]  }
0x1160   :  { %s809_s18 = sshll.u32 %s1126_s8, 4  ;;  %s810_s18 = int_to_ptr.vmem [resolvable:$true] %s809_s18 }
0x1165   :  { %v453_v19 = vpop.permute.xlu0 %452 }
0x1166   :  { %456 = vst.msk [vmem:[#allocation3 + $0x18] sm:$0xff] %vm27_vm0, %v453_v19 }
0x1167   :  { %288 = vrot.lane.b32.xlu1 %v1225_v9, %s1124_s12 }
0x116d   :  { %v699_v39 = vpop.permute.xlu0 %698 }
0x116e   :  { %702 = vst.msk [vmem:[#allocation3 + $0x30] sm:$0xff] %vm27_vm0, %v699_v39 }
0x116f   :  { %534 = vrot.lane.b32.xlu1 %v1281_v48, %s1124_s12 }
0x1177   :  { %787 = vrot.lane.b32.xlu1 %v772_v16, %s1125_s2 }
0x11d1   :  { %v776_v15 = vpop.permute.xlu1 %775 }
0x11d2   :  { %v778_v21 = vmul.f32 %v776_v15, %v759_v43 }
0x11d4   :  { %780 = vrot.lane.b32.xlu2 %v778_v21, %s1124_s12 }
0x11d9   :  { %v289_v22 = vpop.permute.xlu1 %288 }
0x11da   :  { %292 = vst.msk [vmem:[#allocation3 + $0x8] sm:$0xff] %vm27_vm0, %v289_v22 }
0x11dc   :  { %616 = vrot.lane.b32.xlu2 %v1297_v20, %s1124_s12  ;;  %s1128_s12 = smov [#allocation3]  }
0x11dd   :  { %s795_s27 = sshll.u32 %s1128_s12, 4  ;;  %s796_s27 = int_to_ptr.vmem [resolvable:$true] %s795_s27 }
0x11e1   :  { %v535_v23 = vpop.permute.xlu1 %534 }
0x11e2   :  { %538 = vst.msk [vmem:[#allocation3 + $0x20] sm:$0xff] %vm27_vm0, %v535_v23 }
0x11e9   :  { %v788_v9 = vpop.permute.xlu1 %787 }
0x11ea   :  { %790 = vst.msk [vmem:[#allocation7] sm:$0xff] %vm27_vm0, %v788_v9 }
0x122e   :  { %v781_v48 = vpop.permute.xlu2 %780 }
0x122f   :  { %784 = vst.msk [vmem:[#allocation3 + $0x38] sm:$0xff] %vm27_vm0, %v781_v48 }
0x1230   :  { %785 = vst.msk [vmem:[#allocation5] sm:$0xff] %vm27_vm0, %v781_v48 }
0x1231   :  { %814 = dma.vmem_to_hbm [thread:$0]  %s810_s18, 128, %s812_s21, [#allocation6]  }
0x1232   :  { %825 = dma.vmem_to_hbm [thread:$0]  %s821_s23, 128, %s823_s26, [#allocation6]  }
0x1236   :  { %v617_v20 = vpop.permute.xlu2 %616 }
0x1237   :  { %620 = vst.msk [vmem:[#allocation3 + $0x28] sm:$0xff] %vm27_vm0, %v617_v20 }
0x1238   :  { %803 = dma.vmem_to_hbm [thread:$0]  %s796_s27, 1024, %s798_s5, [#allocation4], %s1129_s6, %s1129_s6, %s1130_s30  }
0x1239   :  { %1118 = dma.done.wait [#allocation4], 1024  }
0x123a   :  { %1119 = vsyncadd [#allocation4], 4294966272 }
0x123b   :  { %1120 = dma.done.wait [#allocation6], 256  }
0x123c   :  { %1121 = vsyncadd [#allocation6], 4294967040 }
0x123d   :  { %838 = vsyncpa [#allocation4], 1 }
0x123e   :  { %839 = vsyncpa [#allocation6], 1 }

// kernel: tpu_custom_call.1
= control target key start
LH: loop header
LB: loop body
LE: loop exit
PB: predicated region body
PF: predicated region fallthrough
CT: control target
= control target key end

     0   :  { %12 = vsyncpa [#allocation4], 0  ;;  %vm27_vm0 = vcmask 261120   ;;  %v1122_v2 = vmov 0.0   ;;  %s1354_s0 = inlined_call_operand.vmem [shape: bf16[1,1,64,32], index: 0, kind: input, shape index: {}]   ;;  %s1355_s1 = inlined_call_operand.vmem [shape: bf16[32,128], index: 1, kind: input, shape index: {}]   ;;  %s1356_s2 = inlined_call_operand.vmem [shape: bf16[32,128], index: 2, kind: input, shape index: {}]   ;;  %s1357_s3 = inlined_call_operand.vmem [shape: f32[1,128], index: 3, kind: input, shape index: {}]   ;;  %s1358_s4 = inlined_call_operand.hbm [shape: f32[1,8,8,32], index: 4, kind: output, shape index: {0}]   ;;  %s1359_s5 = inlined_call_operand.hbm [shape: f32[1,8,32], index: 5, kind: output, shape index: {1}]   ;;  %s1360_s6 = inlined_call_operand.hbm [shape: f32[1,8,32], index: 6, kind: output, shape index: {2}]  }
   0x1   :  { %v953_v0 = vld [vmem:[%s1355_s1 + $0x8] sm:$0xff]  ;;  %28 = vst.msk [vmem:[#allocation5] sm:$0xff] %vm27_vm0, %v1122_v2  ;;  %v952_v3 = vld [vmem:[%s1355_s1] sm:$0xff] }
   0x2   :  { %v955_v1 = vld [vmem:[%s1356_s2 + $0x8] sm:$0xff]  ;;  %97 = vmatpush.bf16.msra.mxu0 %v953_v0  ;;  %v954_v4 = vld [vmem:[%s1356_s2] sm:$0xff]  ;;  %29 = vst.msk [vmem:[#allocation7] sm:$0xff] %vm27_vm0, %v1122_v2 }
   0x3   :  { %157 = vmatpush.bf16.msra.mxu1 %v955_v1 }
   0x4   :  { %13 = vsyncpa [#allocation6], 0  ;;  %970 = vmatpush.bf16.msra.mxu3 %v953_v0  ;;  %v948_v5 = vld [vmem:[%s1354_s0] sm:$0xff]  ;;  %s1123_s8 = smov 32   ;;  %v957_v36 = vld [vmem:[%s1356_s2 + $0x8] sm:$0xff]  ;;  %s1124_s12 = smov 64  }
   0x5   :  { %v1188_v8 = vld [vmem:[%s1357_s3] ss:$0 sm:$0xff]  ;;  %242 = vmatpush.bf16.msra.mxu2 %v957_v36  ;;  %s811_s21 = sshll.u32 %s1359_s5, 4  ;;  %s1127_s22 = smov [#allocation7]   ;;  %s812_s21 = int_to_ptr.hbm [resolvable:$true] %s811_s21 }
   0x6   :  { %98 = vmatpush.bf16.msra.mxu0 %v952_v3  ;;  %v956_v37 = vld [vmem:[%s1356_s2] sm:$0xff]  ;;  %s820_s23 = sshll.u32 %s1127_s22, 4  ;;  %s822_s26 = sshll.u32 %s1360_s6, 4  ;;  %s821_s23 = int_to_ptr.vmem [resolvable:$true] %s820_s23  ;;  %s823_s26 = int_to_ptr.hbm [resolvable:$true] %s822_s26 }
   0x7   :  { %158 = vmatpush.bf16.msra.mxu1 %v954_v4  ;;  %v959_v4 = vld [vmem:[%s1356_s2 + $0x8] sm:$0xff]  ;;  %s797_s5 = sshll.u32 %s1358_s4, 4  ;;  %s1129_s6 = smov 128   ;;  %s798_s5 = int_to_ptr.hbm [resolvable:$true] %s797_s5 }
   0x8   :  { %971 = vmatpush.bf16.msra.mxu3 %v952_v3  ;;  %v128_v6 = vld [vmem:[#allocation5] sm:$0xff]  ;;  %v951_v3 = vld [vmem:[%s1354_s0 + $0x18] sm:$0xff]  ;;  %s1130_s30 = smov 8  }
   0x9   :  { %864 = vmatmul.msk.bf16.vlgmr.msra.gmra.mxu0 %vm27_vm0, %v948_v5  ;;  %v131_v7 = vpack.c.bf16 %v128_v6, %v128_v6  ;;  %v129_v15 = vld [vmem:[#allocation7] sm:$0xff]  ;;  %243 = vmatpush.bf16.msra.mxu2 %v956_v37  ;;  %v958_v6 = vld [vmem:[%s1356_s2] sm:$0xff] }
   0xa   :  { %v949_v5 = vld [vmem:[%s1354_s0 + $0x8] sm:$0xff] }
   0xb   :  { %876 = vmatmul.msk.bf16.vlgmr.msra.gmra.mxu1 %vm27_vm0, %v131_v7  ;;  %867 = vmatmul.msk.bf16.vlgmr.msra.gmra.mxu3 %vm27_vm0, %v951_v3 }
   0xc   :  { %324 = vmatpush.bf16.msrb.mxu3 %v959_v4 }
  0x10   :  { %325 = vmatpush.bf16.msrb.mxu3 %v958_v6 }
  0x19   :  { %865 = vmatmul.msk.bf16.gmra.mxu0 %vm27_vm0, %v949_v5 }
  0x86   :  { %v100_v9 = vpop.f32.mrf.mxu0 }
  0x87   :  { %v101_v10 = vadd.f32 %v1188_v8, %v100_v9 }
  0x88   :  { %v160_v11 = vpop.f32.mrf.mxu1 }
  0x89   :  { %v164_v12 = vadd.f32 %v160_v11, %v101_v10 }
  0x8b   :  { %982 = vtanh.f32 %v164_v12  ;;  %v877_v16 = vmul.f32 -1.442695, %v164_v12 }
  0x8d   :  { %984 = vpow2.f32 %v877_v16 }
  0x8e   :  { %v102_v42 = vpop.f32.mrf.mxu0  ;;  %v1231_v12 = vpop.f32.mrf.mxu3 }
  0x8f   :  { %v103_v43 = vadd.f32 %v1188_v8, %v102_v42 }
  0x90   :  { %v162_v13 = vpop.f32.mrf.mxu1 }
  0x91   :  { %v983_v14 = vpop.eup %982 }
  0x92   :  { %191 = vrot.lane.b32.xlu0 %v983_v14, %s1123_s8 }
  0x93   :  { %v985_v17 = vpop.eup %984 }
  0x94   :  { %v168_v18 = vadd.f32 1.0, %v985_v17 }
  0x96   :  { %986 = vrcp.f32 %v168_v18  ;;  %v180_v24 = vand.u32 2147483648, %v168_v18  ;;  %vm174_vm2 = vweird.f32 %v168_v18  ;;  %v178_v25 = vand.u32 2147483647, %v168_v18  ;;  %v1233_v13 = vpop.f32.mrf.mxu3  ;;  %v105_v14 = vpop.f32.mrf.mxu0 }
  0x98   :  { %v181_v27 = vor.u32 1.1754944e-38, %v180_v24  ;;  %vm179_vm4 = vcmp.eq.f32.partialorder %v178_v25, 8.507059e+37 }
  0x9a   :  { %186 = vrot.lane.b32.xlu0 %v129_v15, %s1123_s8  ;;  %v106_v15 = vadd.f32 %v1188_v8, %v105_v14 }
  0x9c   :  { %v987_v19 = vpop.eup %986 }
  0x9d   :  { %v170_v20 = vmul.f32 %v987_v19, %v168_v18  ;;  %vm175_vm1 = vweird.f32 %v987_v19 }
  0x9e   :  { %vm176_vm3 = vmor %vm174_vm2, %vm175_vm1 }
  0x9f   :  { %v171_v21 = vsub.f32 1.0, %v170_v20 }
  0xa1   :  { %v172_v22 = vmul.f32 %v987_v19, %v171_v21 }
  0xa3   :  { %v173_v23 = vadd.f32 %v987_v19, %v172_v22 }
  0xa5   :  { %v177_v26 = vsel %vm176_vm3, %v987_v19, %v173_v23 }
  0xa6   :  { %v182_v29 = vsel %vm179_vm4, %v181_v27, %v177_v26 }
 0x104   :  { %v192_v28 = vpop.permute.xlu0 %191 }
 0x105   :  { %v194_v30 = vmul.f32 %v192_v28, %v182_v29 }
 0x107   :  { %196 = vrot.lane.b32.xlu1 %v194_v30, %s1123_s8 }
 0x10c   :  { %v187_v31 = vpop.permute.xlu0 %186 }
 0x10d   :  { %v189_v32 = vmul.f32 %v187_v31, %v182_v29 }
 0x179   :  { %v197_v33 = vpop.permute.xlu1 %196 }
 0x17a   :  { %v199_v34 = vadd.f32 %v197_v33, %v189_v32 }
 0x17c   :  { %988 = vtanh.f32 %v199_v34 }
 0x182   :  { %v989_v35 = vpop.eup %988 }
 0x183   :  { %202 = vrot.lane.b32.xlu1 %v989_v35, %s1123_s8 }
 0x1f5   :  { %v203_v38 = vpop.permute.xlu1 %202 }
 0x1f6   :  { %v1201_v39 = vmul.f32 %v203_v38, %v182_v29 }
 0x1f8   :  { %v213_v40 = vpack.c.bf16 %v1201_v39, %v1201_v39 }
 0x1fa   :  { %219 = vrot.lane.b32.xlu2 %v213_v40, %s1124_s12  ;;  %v961_v40 = vld [vmem:[%s1356_s2 + $0x8] sm:$0xff] }
 0x1fb   :  { %406 = vmatpush.bf16.msrb.mxu1 %v961_v40 }
 0x254   :  { %v220_v41 = vpop.permute.xlu2 %219 }
 0x255   :  { %886 = vmatmul.msk.bf16.vlgmr.msra.gmra.mxu2 %vm27_vm0, %v220_v41  ;;  %v960_v41 = vld [vmem:[%s1356_s2] sm:$0xff] }
 0x256   :  { %407 = vmatpush.bf16.msrb.mxu1 %v960_v41 }
 0x2d8   :  { %v245_v44 = vpop.f32.mrf.mxu2 }
 0x2d9   :  { %v249_v45 = vadd.f32 %v245_v44, %v103_v43 }
 0x2db   :  { %990 = vtanh.f32 %v249_v45  ;;  %v887_v48 = vmul.f32 -1.442695, %v249_v45 }
 0x2dd   :  { %992 = vpow2.f32 %v887_v48 }
 0x2e0   :  { %v247_v46 = vpop.f32.mrf.mxu2 }
 0x2e1   :  { %v991_v47 = vpop.eup %990  ;;  %v107_v46 = vpop.f32.mrf.mxu0 }
 0x2e2   :  { %272 = vrot.lane.b32.xlu2 %v991_v47, %s1123_s8  ;;  %v108_v47 = vadd.f32 %v1188_v8, %v107_v46  ;;  %v964_v46 = vld [vmem:[%s1356_s2] sm:$0xff] }
 0x2e3   :  { %v993_v49 = vpop.eup %992 }
 0x2e4   :  { %v253_v50 = vadd.f32 1.0, %v993_v49 }
 0x2e6   :  { %994 = vrcp.f32 %v253_v50  ;;  %v265_v56 = vand.u32 2147483648, %v253_v50  ;;  %vm259_vm6 = vweird.f32 %v253_v50  ;;  %v263_v57 = vand.u32 2147483647, %v253_v50 }
 0x2e8   :  { %v266_v59 = vor.u32 1.1754944e-38, %v265_v56  ;;  %vm264_vm8 = vcmp.eq.f32.partialorder %v263_v57, 8.507059e+37 }
 0x2ec   :  { %v995_v51 = vpop.eup %994 }
 0x2ed   :  { %v255_v52 = vmul.f32 %v995_v51, %v253_v50  ;;  %vm260_vm5 = vweird.f32 %v995_v51 }
 0x2ee   :  { %vm261_vm7 = vmor %vm259_vm6, %vm260_vm5 }
 0x2ef   :  { %v256_v53 = vsub.f32 1.0, %v255_v52 }
 0x2f1   :  { %v257_v54 = vmul.f32 %v995_v51, %v256_v53 }
 0x2f3   :  { %v258_v55 = vadd.f32 %v995_v51, %v257_v54 }
 0x2f5   :  { %v262_v58 = vsel %vm261_vm7, %v995_v51, %v258_v55 }
 0x2f6   :  { %v267_v61 = vsel %vm264_vm8, %v266_v59, %v262_v58 }
 0x2f7   :  { %v270_v63 = vmul.f32 %v267_v61, %v199_v34 }
 0x33c   :  { %v273_v60 = vpop.permute.xlu2 %272 }
 0x33d   :  { %v275_v62 = vmul.f32 %v273_v60, %v267_v61 }
 0x33f   :  { %277 = vrot.lane.b32.xlu0 %v275_v62, %s1123_s8 }
 0x3b1   :  { %v278_v0 = vpop.permute.xlu0 %277 }
 0x3b2   :  { %v280_v1 = vadd.f32 %v278_v0, %v270_v63 }
 0x3b4   :  { %996 = vtanh.f32 %v280_v1 }
 0x3ba   :  { %v997_v2 = vpop.eup %996 }
 0x3bb   :  { %283 = vrot.lane.b32.xlu1 %v997_v2, %s1123_s8 }
 0x42d   :  { %v284_v7 = vpop.permute.xlu1 %283 }
 0x42e   :  { %v1225_v9 = vmul.f32 %v284_v7, %v267_v61  ;;  %v963_v7 = vld [vmem:[%s1356_s2 + $0x8] sm:$0xff] }
 0x42f   :  { %488 = vmatpush.bf16.msrb.mxu2 %v963_v7 }
 0x430   :  { %v295_v10 = vpack.c.bf16 %v1225_v9, %v1225_v9 }
 0x432   :  { %301 = vrot.lane.b32.xlu2 %v295_v10, %s1124_s12  ;;  %v950_v10 = vld [vmem:[%s1354_s0 + $0x10] sm:$0xff] }
 0x433   :  { %866 = vmatmul.msk.bf16.gmra.mxu0 %vm27_vm0, %v950_v10 }
 0x48c   :  { %v302_v11 = vpop.permute.xlu2 %301 }
 0x48d   :  { %896 = vmatmul.msk.bf16.vlgmr.msrb.gmra.mxu3 %vm27_vm0, %v302_v11  ;;  %v962_v11 = vld [vmem:[%s1356_s2] sm:$0xff] }
 0x48e   :  { %489 = vmatpush.bf16.msrb.mxu2 %v962_v11 }
 0x510   :  { %v327_v16 = vpop.f32.mrf.mxu3 }
 0x511   :  { %v331_v17 = vadd.f32 %v327_v16, %v106_v15 }
 0x513   :  { %998 = vtanh.f32 %v331_v17  ;;  %v897_v20 = vmul.f32 -1.442695, %v331_v17 }
 0x515   :  { %1000 = vpow2.f32 %v897_v20 }
 0x518   :  { %v329_v18 = vpop.f32.mrf.mxu3 }
 0x519   :  { %v999_v19 = vpop.eup %998  ;;  %v110_v18 = vpop.f32.mrf.mxu0 }
 0x51a   :  { %354 = vrot.lane.b32.xlu0 %v999_v19, %s1123_s8  ;;  %v111_v19 = vadd.f32 %v1188_v8, %v110_v18  ;;  %v966_v18 = vld [vmem:[%s1356_s2] sm:$0xff] }
 0x51b   :  { %v1001_v21 = vpop.eup %1000 }
 0x51c   :  { %v335_v22 = vadd.f32 1.0, %v1001_v21 }
 0x51e   :  { %1002 = vrcp.f32 %v335_v22  ;;  %v347_v28 = vand.u32 2147483648, %v335_v22  ;;  %vm341_vm10 = vweird.f32 %v335_v22  ;;  %v345_v29 = vand.u32 2147483647, %v335_v22 }
 0x520   :  { %v348_v31 = vor.u32 1.1754944e-38, %v347_v28  ;;  %vm346_vm12 = vcmp.eq.f32.partialorder %v345_v29, 8.507059e+37 }
 0x524   :  { %v1003_v23 = vpop.eup %1002 }
 0x525   :  { %v337_v24 = vmul.f32 %v1003_v23, %v335_v22  ;;  %vm342_vm9 = vweird.f32 %v1003_v23 }
 0x526   :  { %vm343_vm11 = vmor %vm341_vm10, %vm342_vm9 }
 0x527   :  { %v338_v25 = vsub.f32 1.0, %v337_v24 }
 0x529   :  { %v339_v26 = vmul.f32 %v1003_v23, %v338_v25 }
 0x52b   :  { %v340_v27 = vadd.f32 %v1003_v23, %v339_v26 }
 0x52d   :  { %v344_v30 = vsel %vm343_vm11, %v1003_v23, %v340_v27 }
 0x52e   :  { %v349_v33 = vsel %vm346_vm12, %v348_v31, %v344_v30 }
 0x52f   :  { %v352_v35 = vmul.f32 %v349_v33, %v280_v1 }
 0x58c   :  { %v355_v32 = vpop.permute.xlu0 %354 }
 0x58d   :  { %v357_v34 = vmul.f32 %v355_v32, %v349_v33 }
 0x58f   :  { %359 = vrot.lane.b32.xlu1 %v357_v34, %s1123_s8 }
 0x601   :  { %v360_v36 = vpop.permute.xlu1 %359 }
 0x602   :  { %v362_v37 = vadd.f32 %v360_v36, %v352_v35 }
 0x604   :  { %1004 = vtanh.f32 %v362_v37 }
 0x60a   :  { %v1005_v38 = vpop.eup %1004 }
 0x60b   :  { %365 = vrot.lane.b32.xlu2 %v1005_v38, %s1123_s8 }
 0x665   :  { %v366_v42 = vpop.permute.xlu2 %365 }
 0x666   :  { %v1245_v43 = vmul.f32 %v366_v42, %v349_v33 }
 0x668   :  { %v377_v44 = vpack.c.bf16 %v1245_v43, %v1245_v43 }
 0x66a   :  { %383 = vrot.lane.b32.xlu0 %v377_v44, %s1124_s12 }
 0x6dc   :  { %v384_v45 = vpop.permute.xlu0 %383 }
 0x6dd   :  { %906 = vmatmul.msk.bf16.vlgmr.msrb.gmra.mxu1 %vm27_vm0, %v384_v45  ;;  %v965_v45 = vld [vmem:[%s1356_s2 + $0x8] sm:$0xff] }
 0x6de   :  { %570 = vmatpush.bf16.msra.mxu3 %v965_v45 }
 0x6e2   :  { %571 = vmatpush.bf16.msra.mxu3 %v964_v46 }
 0x75a   :  { %v409_v48 = vpop.f32.mrf.mxu1 }
 0x75b   :  { %v413_v49 = vadd.f32 %v409_v48, %v108_v47 }
 0x75d   :  { %1006 = vtanh.f32 %v413_v49  ;;  %v907_v52 = vmul.f32 -1.442695, %v413_v49 }
 0x75f   :  { %1008 = vpow2.f32 %v907_v52 }
 0x762   :  { %v411_v50 = vpop.f32.mrf.mxu1 }
 0x763   :  { %v1007_v51 = vpop.eup %1006 }
 0x764   :  { %436 = vrot.lane.b32.xlu1 %v1007_v51, %s1123_s8  ;;  %v112_v51 = vpop.f32.mrf.mxu0 }
 0x765   :  { %v1009_v53 = vpop.eup %1008  ;;  %v113_v52 = vadd.f32 %v1188_v8, %v112_v51 }
 0x766   :  { %v417_v54 = vadd.f32 1.0, %v1009_v53 }
 0x768   :  { %1010 = vrcp.f32 %v417_v54  ;;  %v429_v60 = vand.u32 2147483648, %v417_v54  ;;  %vm423_vm14 = vweird.f32 %v417_v54  ;;  %v427_v61 = vand.u32 2147483647, %v417_v54 }
 0x76a   :  { %v430_v63 = vor.u32 1.1754944e-38, %v429_v60  ;;  %vm428_vm1 = vcmp.eq.f32.partialorder %v427_v61, 8.507059e+37 }
 0x76e   :  { %v1011_v55 = vpop.eup %1010 }
 0x76f   :  { %v419_v56 = vmul.f32 %v1011_v55, %v417_v54  ;;  %vm424_vm13 = vweird.f32 %v1011_v55 }
 0x770   :  { %vm425_vm15 = vmor %vm423_vm14, %vm424_vm13 }
 0x771   :  { %v420_v57 = vsub.f32 1.0, %v419_v56 }
 0x773   :  { %v421_v58 = vmul.f32 %v1011_v55, %v420_v57 }
 0x775   :  { %v422_v59 = vadd.f32 %v1011_v55, %v421_v58 }
 0x777   :  { %v426_v62 = vsel %vm425_vm15, %v1011_v55, %v422_v59 }
 0x778   :  { %v431_v1 = vsel %vm428_vm1, %v430_v63, %v426_v62 }
 0x779   :  { %v434_v3 = vmul.f32 %v431_v1, %v362_v37 }
 0x7d6   :  { %v437_v0 = vpop.permute.xlu1 %436 }
 0x7d7   :  { %v439_v2 = vmul.f32 %v437_v0, %v431_v1 }
 0x7d9   :  { %441 = vrot.lane.b32.xlu2 %v439_v2, %s1123_s8 }
 0x833   :  { %v442_v4 = vpop.permute.xlu2 %441 }
 0x834   :  { %v444_v5 = vadd.f32 %v442_v4, %v434_v3 }
 0x836   :  { %1012 = vtanh.f32 %v444_v5 }
 0x83c   :  { %v1013_v6 = vpop.eup %1012 }
 0x83d   :  { %447 = vrot.lane.b32.xlu0 %v1013_v6, %s1123_s8 }
 0x8af   :  { %v448_v14 = vpop.permute.xlu0 %447 }
 0x8b0   :  { %v1265_v15 = vmul.f32 %v448_v14, %v431_v1 }
 0x8b2   :  { %v459_v16 = vpack.c.bf16 %v1265_v15, %v1265_v15 }
 0x8b4   :  { %465 = vrot.lane.b32.xlu1 %v459_v16, %s1124_s12 }
 0x926   :  { %v466_v17 = vpop.permute.xlu1 %465 }
 0x927   :  { %916 = vmatmul.msk.bf16.vlgmr.msrb.gmra.mxu2 %vm27_vm0, %v466_v17  ;;  %v967_v17 = vld [vmem:[%s1356_s2 + $0x8] sm:$0xff] }
 0x928   :  { %652 = vmatpush.bf16.msra.mxu1 %v967_v17 }
 0x92c   :  { %653 = vmatpush.bf16.msra.mxu1 %v966_v18 }
 0x9aa   :  { %v491_v20 = vpop.f32.mrf.mxu2 }
 0x9ab   :  { %v495_v21 = vadd.f32 %v491_v20, %v111_v19 }
 0x9ad   :  { %1014 = vtanh.f32 %v495_v21  ;;  %v917_v24 = vmul.f32 -1.442695, %v495_v21 }
 0x9af   :  { %1016 = vpow2.f32 %v917_v24 }
 0x9b2   :  { %v493_v22 = vpop.f32.mrf.mxu2 }
 0x9b3   :  { %v1015_v23 = vpop.eup %1014 }
 0x9b4   :  { %518 = vrot.lane.b32.xlu2 %v1015_v23, %s1123_s8  ;;  %v116_v23 = vadd.f32 %v1188_v8, %v1231_v12 }
 0x9b5   :  { %v1017_v25 = vpop.eup %1016 }
 0x9b6   :  { %v499_v26 = vadd.f32 1.0, %v1017_v25 }
 0x9b8   :  { %1018 = vrcp.f32 %v499_v26  ;;  %v511_v32 = vand.u32 2147483648, %v499_v26  ;;  %vm505_vm3 = vweird.f32 %v499_v26  ;;  %v509_v33 = vand.u32 2147483647, %v499_v26 }
 0x9ba   :  { %v512_v35 = vor.u32 1.1754944e-38, %v511_v32  ;;  %vm510_vm5 = vcmp.eq.f32.partialorder %v509_v33, 8.507059e+37 }
 0x9be   :  { %v1019_v27 = vpop.eup %1018 }
 0x9bf   :  { %v501_v28 = vmul.f32 %v1019_v27, %v499_v26  ;;  %vm506_vm2 = vweird.f32 %v1019_v27 }
 0x9c0   :  { %vm507_vm4 = vmor %vm505_vm3, %vm506_vm2 }
 0x9c1   :  { %v502_v29 = vsub.f32 1.0, %v501_v28 }
 0x9c3   :  { %v503_v30 = vmul.f32 %v1019_v27, %v502_v29 }
 0x9c5   :  { %v504_v31 = vadd.f32 %v1019_v27, %v503_v30 }
 0x9c7   :  { %v508_v34 = vsel %vm507_vm4, %v1019_v27, %v504_v31 }
 0x9c8   :  { %v513_v37 = vsel %vm510_vm5, %v512_v35, %v508_v34 }
 0x9c9   :  { %v516_v40 = vmul.f32 %v513_v37, %v444_v5 }
 0xa0e   :  { %v519_v36 = vpop.permute.xlu2 %518 }
 0xa0f   :  { %v521_v38 = vmul.f32 %v519_v36, %v513_v37 }
 0xa11   :  { %523 = vrot.lane.b32.xlu0 %v521_v38, %s1123_s8 }
 0xa83   :  { %v524_v41 = vpop.permute.xlu0 %523 }
 0xa84   :  { %v526_v42 = vadd.f32 %v524_v41, %v516_v40 }
 0xa86   :  { %1020 = vtanh.f32 %v526_v42 }
 0xa8c   :  { %v1021_v44 = vpop.eup %1020 }
 0xa8d   :  { %529 = vrot.lane.b32.xlu1 %v1021_v44, %s1123_s8 }
 0xaff   :  { %v530_v47 = vpop.permute.xlu1 %529 }
 0xb00   :  { %v1281_v48 = vmul.f32 %v530_v47, %v513_v37 }
 0xb02   :  { %v541_v49 = vpack.c.bf16 %v1281_v48, %v1281_v48 }
 0xb04   :  { %547 = vrot.lane.b32.xlu2 %v541_v49, %s1124_s12  ;;  %v969_v49 = vld [vmem:[%s1356_s2 + $0x8] sm:$0xff] }
 0xb05   :  { %734 = vmatpush.bf16.msra.mxu2 %v969_v49 }
 0xb5e   :  { %v548_v50 = vpop.permute.xlu2 %547 }
 0xb5f   :  { %926 = vmatmul.msk.bf16.vlgmr.msra.gmra.mxu3 %vm27_vm0, %v548_v50  ;;  %v968_v50 = vld [vmem:[%s1356_s2] sm:$0xff]  ;;  %s1125_s2 = smov 96  }
 0xb60   :  { %735 = vmatpush.bf16.msra.mxu2 %v968_v50 }
 0xbe2   :  { %v573_v53 = vpop.f32.mrf.mxu3 }
 0xbe3   :  { %v577_v54 = vadd.f32 %v573_v53, %v113_v52 }
 0xbe5   :  { %1022 = vtanh.f32 %v577_v54  ;;  %v927_v57 = vmul.f32 -1.442695, %v577_v54 }
 0xbe7   :  { %1024 = vpow2.f32 %v927_v57 }
 0xbea   :  { %v575_v55 = vpop.f32.mrf.mxu3 }
 0xbeb   :  { %v1023_v56 = vpop.eup %1022  ;;  %v118_v55 = vadd.f32 %v1188_v8, %v1233_v13 }
 0xbec   :  { %600 = vrot.lane.b32.xlu0 %v1023_v56, %s1123_s8 }
 0xbed   :  { %v1025_v58 = vpop.eup %1024 }
 0xbee   :  { %v581_v59 = vadd.f32 1.0, %v1025_v58 }
 0xbf0   :  { %1026 = vrcp.f32 %v581_v59  ;;  %v593_v1 = vand.u32 2147483648, %v581_v59  ;;  %vm587_vm7 = vweird.f32 %v581_v59  ;;  %v591_v2 = vand.u32 2147483647, %v581_v59 }
 0xbf2   :  { %v594_v4 = vor.u32 1.1754944e-38, %v593_v1  ;;  %vm592_vm9 = vcmp.eq.f32.partialorder %v591_v2, 8.507059e+37 }
 0xbf6   :  { %v1027_v60 = vpop.eup %1026 }
 0xbf7   :  { %v583_v61 = vmul.f32 %v1027_v60, %v581_v59  ;;  %vm588_vm6 = vweird.f32 %v1027_v60 }
 0xbf8   :  { %vm589_vm8 = vmor %vm587_vm7, %vm588_vm6 }
 0xbf9   :  { %v584_v62 = vsub.f32 1.0, %v583_v61 }
 0xbfb   :  { %v585_v63 = vmul.f32 %v1027_v60, %v584_v62 }
 0xbfd   :  { %v586_v0 = vadd.f32 %v1027_v60, %v585_v63 }
 0xbff   :  { %v590_v3 = vsel %vm589_vm8, %v1027_v60, %v586_v0 }
 0xc00   :  { %v595_v6 = vsel %vm592_vm9, %v594_v4, %v590_v3 }
 0xc01   :  { %v598_v10 = vmul.f32 %v595_v6, %v526_v42 }
 0xc5e   :  { %v601_v5 = vpop.permute.xlu0 %600 }
 0xc5f   :  { %v603_v7 = vmul.f32 %v601_v5, %v595_v6 }
 0xc61   :  { %605 = vrot.lane.b32.xlu1 %v603_v7, %s1123_s8 }
 0xcd3   :  { %v606_v11 = vpop.permute.xlu1 %605 }
 0xcd4   :  { %v608_v14 = vadd.f32 %v606_v11, %v598_v10 }
 0xcd6   :  { %1028 = vtanh.f32 %v608_v14 }
 0xcdc   :  { %v1029_v16 = vpop.eup %1028 }
 0xcdd   :  { %611 = vrot.lane.b32.xlu2 %v1029_v16, %s1123_s8 }
 0xd37   :  { %v612_v19 = vpop.permute.xlu2 %611 }
 0xd38   :  { %v1297_v20 = vmul.f32 %v612_v19, %v595_v6 }
 0xd3a   :  { %v623_v21 = vpack.c.bf16 %v1297_v20, %v1297_v20 }
 0xd3c   :  { %629 = vrot.lane.b32.xlu0 %v623_v21, %s1124_s12 }
 0xdae   :  { %v630_v22 = vpop.permute.xlu0 %629 }
 0xdaf   :  { %936 = vmatmul.msk.bf16.vlgmr.msra.gmra.mxu1 %vm27_vm0, %v630_v22 }
 0xe2c   :  { %v655_v24 = vpop.f32.mrf.mxu1 }
 0xe2d   :  { %v659_v25 = vadd.f32 %v655_v24, %v116_v23 }
 0xe2f   :  { %1030 = vtanh.f32 %v659_v25  ;;  %v937_v28 = vmul.f32 -1.442695, %v659_v25 }
 0xe31   :  { %1032 = vpow2.f32 %v937_v28 }
 0xe34   :  { %v657_v26 = vpop.f32.mrf.mxu1 }
 0xe35   :  { %v1031_v27 = vpop.eup %1030 }
 0xe36   :  { %682 = vrot.lane.b32.xlu1 %v1031_v27, %s1123_s8 }
 0xe37   :  { %v1033_v29 = vpop.eup %1032 }
 0xe38   :  { %v663_v30 = vadd.f32 1.0, %v1033_v29 }
 0xe3a   :  { %1034 = vrcp.f32 %v663_v30  ;;  %v675_v36 = vand.u32 2147483648, %v663_v30  ;;  %vm669_vm11 = vweird.f32 %v663_v30  ;;  %v673_v12 = vand.u32 2147483647, %v663_v30 }
 0xe3c   :  { %v676_v38 = vor.u32 1.1754944e-38, %v675_v36  ;;  %vm674_vm13 = vcmp.eq.f32.partialorder %v673_v12, 8.507059e+37 }
 0xe40   :  { %v1035_v31 = vpop.eup %1034 }
 0xe41   :  { %v665_v32 = vmul.f32 %v1035_v31, %v663_v30  ;;  %vm670_vm10 = vweird.f32 %v1035_v31 }
 0xe42   :  { %vm671_vm12 = vmor %vm669_vm11, %vm670_vm10 }
 0xe43   :  { %v666_v33 = vsub.f32 1.0, %v665_v32 }
 0xe45   :  { %v667_v34 = vmul.f32 %v1035_v31, %v666_v33 }
 0xe47   :  { %v668_v35 = vadd.f32 %v1035_v31, %v667_v34 }
 0xe49   :  { %v672_v37 = vsel %vm671_vm12, %v1035_v31, %v668_v35 }
 0xe4a   :  { %v677_v41 = vsel %vm674_vm13, %v676_v38, %v672_v37 }
 0xe4b   :  { %v680_v44 = vmul.f32 %v677_v41, %v608_v14 }
 0xea8   :  { %v683_v40 = vpop.permute.xlu1 %682 }
 0xea9   :  { %v685_v42 = vmul.f32 %v683_v40, %v677_v41 }
 0xeab   :  { %687 = vrot.lane.b32.xlu2 %v685_v42, %s1123_s8 }
 0xf05   :  { %v688_v45 = vpop.permute.xlu2 %687 }
 0xf06   :  { %v690_v46 = vadd.f32 %v688_v45, %v680_v44 }
 0xf08   :  { %1036 = vtanh.f32 %v690_v46 }
 0xf0e   :  { %v1037_v47 = vpop.eup %1036 }
 0xf0f   :  { %693 = vrot.lane.b32.xlu0 %v1037_v47, %s1123_s8 }
 0xf81   :  { %v694_v51 = vpop.permute.xlu0 %693 }
 0xf82   :  { %v696_v52 = vmul.f32 %v694_v51, %v677_v41 }
 0xf84   :  { %v705_v53 = vpack.c.bf16 %v696_v52, %v696_v52 }
 0xf86   :  { %711 = vrot.lane.b32.xlu1 %v705_v53, %s1124_s12 }
 0xff8   :  { %v712_v54 = vpop.permute.xlu1 %711 }
 0xff9   :  { %946 = vmatmul.msk.bf16.vlgmr.msra.gmra.mxu2 %vm27_vm0, %v712_v54 }
0x107c   :  { %v737_v56 = vpop.f32.mrf.mxu2 }
0x107d   :  { %v741_v57 = vadd.f32 %v737_v56, %v118_v55 }
0x107f   :  { %1038 = vtanh.f32 %v741_v57  ;;  %v947_v60 = vmul.f32 -1.442695, %v741_v57 }
0x1081   :  { %1040 = vpow2.f32 %v947_v60 }
0x1084   :  { %v739_v58 = vpop.f32.mrf.mxu2 }
0x1085   :  { %v1039_v59 = vpop.eup %1038 }
0x1086   :  { %764 = vrot.lane.b32.xlu2 %v1039_v59, %s1123_s8 }
0x1087   :  { %v1041_v61 = vpop.eup %1040 }
0x1088   :  { %v745_v62 = vadd.f32 1.0, %v1041_v61 }
0x108a   :  { %1042 = vrcp.f32 %v745_v62  ;;  %v757_v13 = vand.u32 2147483648, %v745_v62  ;;  %vm751_vm15 = vweird.f32 %v745_v62  ;;  %v755_v3 = vand.u32 2147483647, %v745_v62 }
0x108c   :  { %v758_v5 = vor.u32 1.1754944e-38, %v757_v13  ;;  %vm756_vm2 = vcmp.eq.f32.partialorder %v755_v3, 8.507059e+37 }
0x108e   :  { %370 = vrot.lane.b32.xlu2 %v1245_v43, %s1124_s12 }
0x1090   :  { %v1043_v63 = vpop.eup %1042 }
0x1091   :  { %v747_v0 = vmul.f32 %v1043_v63, %v745_v62  ;;  %vm752_vm14 = vweird.f32 %v1043_v63 }
0x1092   :  { %vm753_vm1 = vmor %vm751_vm15, %vm752_vm14 }
0x1093   :  { %v748_v1 = vsub.f32 1.0, %v747_v0 }
0x1095   :  { %v749_v2 = vmul.f32 %v1043_v63, %v748_v1 }
0x1097   :  { %v750_v8 = vadd.f32 %v1043_v63, %v749_v2 }
0x1099   :  { %v754_v4 = vsel %vm753_vm1, %v1043_v63, %v750_v8 }
0x109a   :  { %v759_v43 = vsel %vm756_vm2, %v758_v5, %v754_v4 }
0x109b   :  { %v762_v11 = vmul.f32 %v759_v43, %v690_v46 }
0x10e0   :  { %v765_v6 = vpop.permute.xlu2 %764 }
0x10e1   :  { %v767_v7 = vmul.f32 %v765_v6, %v759_v43 }
0x10e3   :  { %769 = vrot.lane.b32.xlu0 %v767_v7, %s1123_s8 }
0x10e8   :  { %v371_v10 = vpop.permute.xlu2 %370 }
0x10e9   :  { %374 = vst.msk [vmem:[#allocation3 + $0x10] sm:$0xff] %vm27_vm0, %v371_v10 }
0x10eb   :  { %207 = vrot.lane.b32.xlu0 %v1201_v39, %s1124_s12 }
0x10f3   :  { %452 = vrot.lane.b32.xlu0 %v1265_v15, %s1124_s12 }
0x10fb   :  { %698 = vrot.lane.b32.xlu0 %v696_v52, %s1124_s12 }
0x1155   :  { %v770_v14 = vpop.permute.xlu0 %769 }
0x1156   :  { %v772_v16 = vadd.f32 %v770_v14, %v762_v11 }
0x1158   :  { %1044 = vtanh.f32 %v772_v16 }
0x115d   :  { %v208_v17 = vpop.permute.xlu0 %207 }
0x115e   :  { %v1045_v18 = vpop.eup %1044  ;;  %210 = vst.msk [vmem:[#allocation3] sm:$0xff] %vm27_vm0, %v208_v17 }
0x115f   :  { %775 = vrot.lane.b32.xlu1 %v1045_v18, %s1123_s8  ;;  %s1126_s8 = smov [#allocation5]  }
0x1160   :  { %s809_s18 = sshll.u32 %s1126_s8, 4  ;;  %s810_s18 = int_to_ptr.vmem [resolvable:$true] %s809_s18 }
0x1165   :  { %v453_v19 = vpop.permute.xlu0 %452 }
0x1166   :  { %456 = vst.msk [vmem:[#allocation3 + $0x18] sm:$0xff] %vm27_vm0, %v453_v19 }
0x1167   :  { %288 = vrot.lane.b32.xlu1 %v1225_v9, %s1124_s12 }
0x116d   :  { %v699_v39 = vpop.permute.xlu0 %698 }
0x116e   :  { %702 = vst.msk [vmem:[#allocation3 + $0x30] sm:$0xff] %vm27_vm0, %v699_v39 }
0x116f   :  { %534 = vrot.lane.b32.xlu1 %v1281_v48, %s1124_s12 }
0x1177   :  { %787 = vrot.lane.b32.xlu1 %v772_v16, %s1125_s2 }
0x11d1   :  { %v776_v15 = vpop.permute.xlu1 %775 }
0x11d2   :  { %v778_v21 = vmul.f32 %v776_v15, %v759_v43 }
0x11d4   :  { %780 = vrot.lane.b32.xlu2 %v778_v21, %s1124_s12 }
0x11d9   :  { %v289_v22 = vpop.permute.xlu1 %288 }
0x11da   :  { %292 = vst.msk [vmem:[#allocation3 + $0x8] sm:$0xff] %vm27_vm0, %v289_v22 }
0x11dc   :  { %616 = vrot.lane.b32.xlu2 %v1297_v20, %s1124_s12  ;;  %s1128_s12 = smov [#allocation3]  }
0x11dd   :  { %s795_s27 = sshll.u32 %s1128_s12, 4  ;;  %s796_s27 = int_to_ptr.vmem [resolvable:$true] %s795_s27 }
0x11e1   :  { %v535_v23 = vpop.permute.xlu1 %534 }
0x11e2   :  { %538 = vst.msk [vmem:[#allocation3 + $0x20] sm:$0xff] %vm27_vm0, %v535_v23 }
0x11e9   :  { %v788_v9 = vpop.permute.xlu1 %787 }
0x11ea   :  { %790 = vst.msk [vmem:[#allocation7] sm:$0xff] %vm27_vm0, %v788_v9 }
0x122e   :  { %v781_v48 = vpop.permute.xlu2 %780 }
0x122f   :  { %784 = vst.msk [vmem:[#allocation3 + $0x38] sm:$0xff] %vm27_vm0, %v781_v48 }
0x1230   :  { %785 = vst.msk [vmem:[#allocation5] sm:$0xff] %vm27_vm0, %v781_v48 }
0x1231   :  { %814 = dma.vmem_to_hbm [thread:$0]  %s810_s18, 128, %s812_s21, [#allocation6]  }
0x1232   :  { %825 = dma.vmem_to_hbm [thread:$0]  %s821_s23, 128, %s823_s26, [#allocation6]  }
0x1236   :  { %v617_v20 = vpop.permute.xlu2 %616 }
0x1237   :  { %620 = vst.msk [vmem:[#allocation3 + $0x28] sm:$0xff] %vm27_vm0, %v617_v20 }
0x1238   :  { %803 = dma.vmem_to_hbm [thread:$0]  %s796_s27, 1024, %s798_s5, [#allocation4], %s1129_s6, %s1129_s6, %s1130_s30  }
0x1239   :  { %1118 = dma.done.wait [#allocation4], 1024  }
0x123a   :  { %1119 = vsyncadd [#allocation4], 4294966272 }
0x123b   :  { %1120 = dma.done.wait [#allocation6], 256  }
0x123c   :  { %1121 = vsyncadd [#allocation6], 4294967040 }
0x123d   :  { %838 = vsyncpa [#allocation4], 1 }
0x123e   :  { %839 = vsyncpa [#allocation6], 1 }

</bundles_post_ra>
